<compile_context>
chip_gen: v7x
topology: tpu7x:2x2x1
jax: 0.10.0
libtpu: 0.0.40
codegen_flags: <defaults>
</compile_context>

<pallas_src>
import functools

import jax
import jax.numpy as jnp
from jax.experimental import pallas as pl
from jax.experimental.pallas import tpu as pltpu


def _postnet_kernel(*refs, n_layers, K, T, Tpad, pad, halo):
    """refs = (x_ref, w_0, b_0, ..., w_{L-1}, b_{L-1}, o_ref, h_a, h_b).

    x_ref : (1, C0, T)                 unpadded input, one batch element
    w_l   : (K, C_out_l, C_in_l) bf16  BN-folded conv weights (one matrix/tap)
    b_l   : (C_out_l, 1) f32           BN-folded bias
    o_ref : (1, odim, T) f32
    h_a/h_b: (rows, halo + Tpad + 128) bf16 VMEM ping-pong activation buffers
    """
    x_ref = refs[0]
    wb = refs[1:1 + 2 * n_layers]
    o_ref = refs[1 + 2 * n_layers]
    h_a = refs[2 + 2 * n_layers]
    h_b = refs[3 + 2 * n_layers]
    scratch = (h_a, h_b)

    rows = h_a.shape[0]
    zband = jnp.zeros((rows, pad), h_a.dtype) if pad else None

    # Zero only the halo columns the conv taps actually read: `pad` columns
    # left of the window and `pad` columns right of the Tpad window.  Re-zeroed
    # every grid step so no cross-step/cross-core ordering is assumed.  The
    # Tpad centre is fully overwritten each layer and never needs zeroing.
    if pad:
        h_a[:, halo - pad:halo] = zband
        h_b[:, halo - pad:halo] = zband
        h_a[:, halo + Tpad:halo + Tpad + pad] = zband
        h_b[:, halo + Tpad:halo + Tpad + pad] = zband

    # Copy this batch element into the zero-haloed scratch (bf16) at lane
    # offset `halo` (=128) so every later activation store is lane-aligned.
    c_in0 = x_ref.shape[1]
    h_a[0:c_in0, halo:halo + T] = x_ref[0].astype(h_a.dtype)
    if pad:
        # Zero band just right of the valid T columns: read by the next conv
        # as its right zero-padding.
        h_a[:, halo + T:halo + T + pad] = zband

    base = halo - pad
    for layer in range(n_layers):
        w_ref = wb[2 * layer]
        b_ref = wb[2 * layer + 1]
        c_out = w_ref.shape[1]
        c_in = w_ref.shape[2]
        src = scratch[layer % 2]
        last = layer == n_layers - 1

        # Conv1d as K shifted MXU matmuls over Ref *views* (no materialised
        # copy of the previous activation); bf16 operands, f32 accumulation.
        acc = jnp.zeros((c_out, Tpad), jnp.float32)
        for k in range(K):
            win = src[0:c_in, base + k:base + k + Tpad]
            acc = acc + jnp.dot(w_ref[k], win,
                                preferred_element_type=jnp.float32)
        acc = acc + b_ref[...]            # (C_out, 1) broadcast over lanes (VPU)

        if last:
            # Last layer: no tanh; Dropout is identity in eval mode.
            o_ref[0] = acc[:, :T].astype(o_ref.dtype)
        else:
            acc = jnp.tanh(acc)           # EUP; f32 keeps v5e happy, one cast
            dst = scratch[(layer + 1) % 2]
            # Full-width, 128-lane-aligned, unmasked store of the activation...
            dst[0:c_out, halo:halo + Tpad] = acc.astype(dst.dtype)
            if pad:
                # ...then restore the pad-wide zero band the next layer reads
                # as its right zero-padding.
                dst[:, halo + T:halo + T + pad] = zband


def postnet_forward(xs, conv_weights, bn_params, *, eps=1e-5):
    """Eval-mode Postnet forward.

    xs           : (B, C0, T) float — C0 must equal layer 0's input channels.
    conv_weights : list of (C_out, C_in, K) arrays (PyTorch Conv1d layout).
    bn_params    : list of (gamma, beta, running_mean, running_var), each (C_out,).
    Returns (B, odim, T) float32.
    """
    B, c0, T = xs.shape
    n_layers = len(conv_weights)
    K = int(conv_weights[0].shape[-1])
    assert K % 2 == 1, "odd kernel size required (same-length conv)"
    assert all(int(w.shape[-1]) == K for w in conv_weights), \
        "all layers must share the same kernel size"
    prev = c0
    for w in conv_weights:
        assert int(w.shape[1]) == prev, "conv channel chain mismatch"
        prev = int(w.shape[0])
    odim = int(conv_weights[-1].shape[0])
    pad = (K - 1) // 2
    assert pad <= 128
    halo = 128                                  # left halo -> aligned stores
    Tpad = -(-T // 128) * 128                   # T rounded up to lane multiple
    rows = max(max(int(w.shape[0]), int(w.shape[1])) for w in conv_weights)
    w_scr = halo + Tpad + 128                   # 128-wide right margin

    # Fold BatchNorm (running stats) into conv weight + bias; reorder each
    # weight to (K, C_out, C_in) and cast to bf16 so the MXU runs at native
    # precision (accumulation stays f32 in the kernel).
    ops = []
    flops = 0
    bytes_accessed = int(xs.size) * xs.dtype.itemsize + B * odim * T * 4
    for W, (gamma, beta, mean, var) in zip(conv_weights, bn_params):
        scale = gamma / jnp.sqrt(var + eps)                       # (C_out,)
        Wf = W.astype(jnp.float32) * scale[:, None, None]         # (C_out,C_in,K)
        bf = (beta - mean * scale).astype(jnp.float32)            # (C_out,)
        ops.append(jnp.transpose(Wf, (2, 0, 1)).astype(jnp.bfloat16))
        ops.append(bf.reshape(-1, 1))
        c_out, c_in, k = (int(s) for s in W.shape)
        flops += 2 * B * Tpad * c_out * c_in * k
        bytes_accessed += int(W.size) * 2 + c_out * 4
    transcendentals = B * Tpad * rows * max(n_layers - 1, 0)

    # No wrapper-side jnp.pad: the unpadded (C0, T) block is DMA'd and the
    # kernel copies it into the zero-haloed VMEM scratch itself.
    in_specs = [pl.BlockSpec((1, c0, T), lambda b: (b, 0, 0))]
    for op in ops:
        zeros = (0,) * op.ndim
        # Constant index_map -> each weight is DMA'd once and stays resident
        # across the whole batch grid.
        # TODO(synk): single-buffer the resident weights (pl.Buffered(1)) once
        # pipeline_mode on top-level pallas_call specs is available everywhere.
        in_specs.append(pl.BlockSpec(op.shape, lambda b, _z=zeros: _z))

    # Explicit VMEM budget: weights (conservatively counted double-buffered)
    # + 2 bf16 activation scratch buffers + double-buffered x/o blocks.
    weight_bytes = sum(int(o.size) * o.dtype.itemsize for o in ops)
    scratch_bytes = 2 * rows * w_scr * 2
    io_bytes = 2 * 2 * (c0 * T + odim * T) * 4
    need = 2 * weight_bytes + scratch_bytes + io_bytes
    vmem_limit = int(min(max(2 * need, 32 * 1024 * 1024), 64 * 1024 * 1024))

    kernel = functools.partial(_postnet_kernel, n_layers=n_layers, K=K, T=T,
                               Tpad=Tpad, pad=pad, halo=halo)

    return pl.pallas_call(
        kernel,
        out_shape=jax.ShapeDtypeStruct((B, odim, T), jnp.float32),
        grid=(B,),
        in_specs=in_specs,
        out_specs=pl.BlockSpec((1, odim, T), lambda b: (b, 0, 0)),
        scratch_shapes=[pltpu.VMEM((rows, w_scr), jnp.bfloat16),
                        pltpu.VMEM((rows, w_scr), jnp.bfloat16)],
        compiler_params=pltpu.CompilerParams(
            dimension_semantics=("parallel",),
            vmem_limit_bytes=vmem_limit),
        cost_estimate=pl.CostEstimate(
            flops=flops,
            transcendentals=transcendentals,
            bytes_accessed=bytes_accessed),
    )(xs, *ops)


def _reference_forward(xs, conv_weights, bn_params, *, eps=1e-5):
    """Pure-JAX eval-mode reference (matches torch Conv1d+BN(eval)+Tanh), f32."""
    h = xs.astype(jnp.float32)
    n = len(conv_weights)
    for i, (W, (g, b, m, v)) in enumerate(zip(conv_weights, bn_params)):
        K = W.shape[-1]
        pad = (K - 1) // 2
        h = jax.lax.conv_general_dilated(
            h, W.astype(jnp.float32), window_strides=(1,),
            padding=((pad, pad),),
            dimension_numbers=("NCH", "OIH", "NCH"),
            precision=jax.lax.Precision.HIGHEST)
        scale = g / jnp.sqrt(v + eps)
        h = h * scale[None, :, None] + (b - m * scale)[None, :, None]
        if i < n - 1:
            h = jnp.tanh(h)
    return h


if __name__ == "__main__":
    key = jax.random.PRNGKey(0)

    # Small shapes consistent with the module: (B, odim, Tmax), 5 layers.
    B, odim, T = 2, 4, 16
    n_layers, n_chans, K = 5, 32, 5

    keys = jax.random.split(key, 1 + 5 * n_layers)
    xs = jax.random.normal(keys[0], (B, odim, T), dtype=jnp.float32)

    conv_weights = []
    bn_params = []
    idx = 1
    for layer in range(n_layers):
        c_in = odim if layer == 0 else n_chans
        c_out = odim if layer == n_layers - 1 else n_chans
        w = 0.1 * jax.random.normal(keys[idx], (c_out, c_in, K),
                                    dtype=jnp.float32)
        gamma = 1.0 + 0.1 * jax.random.normal(keys[idx + 1], (c_out,),
                                              dtype=jnp.float32)
        beta = 0.1 * jax.random.normal(keys[idx + 2], (c_out,),
                                       dtype=jnp.float32)
        mean = 0.1 * jax.random.normal(keys[idx + 3], (c_out,),
                                       dtype=jnp.float32)
        var = 0.5 + jax.random.uniform(keys[idx + 4], (c_out,),
                                       dtype=jnp.float32)
        idx += 5
        conv_weights.append(w)
        bn_params.append((gamma, beta, mean, var))

    out = postnet_forward(xs, conv_weights, bn_params)
    jax.block_until_ready(out)

    ref = _reference_forward(xs, conv_weights, bn_params)
    assert out.shape == (B, odim, T), out.shape
    # Tolerance reflects bf16 weights/activations in the kernel vs f32 reference.
    max_err = float(jnp.max(jnp.abs(out - ref)))
    assert jnp.allclose(out, ref, rtol=5e-2, atol=5e-2), max_err

    print("KERNEL_OK")
</pallas_src>

<mosaic_0001>
module attributes {stable_mosaic.version = 11 : i64} {
  func.func @_postnet_kernel(%arg0: i32, %arg1: memref<1x4x16xf32, #tpu.memory_space<vmem>>, %arg2: memref<5x32x4xbf16, #tpu.memory_space<vmem>>, %arg3: memref<32x1xf32, #tpu.memory_space<vmem>>, %arg4: memref<5x32x32xbf16, #tpu.memory_space<vmem>>, %arg5: memref<32x1xf32, #tpu.memory_space<vmem>>, %arg6: memref<5x32x32xbf16, #tpu.memory_space<vmem>>, %arg7: memref<32x1xf32, #tpu.memory_space<vmem>>, %arg8: memref<5x32x32xbf16, #tpu.memory_space<vmem>>, %arg9: memref<32x1xf32, #tpu.memory_space<vmem>>, %arg10: memref<5x4x32xbf16, #tpu.memory_space<vmem>>, %arg11: memref<4x1xf32, #tpu.memory_space<vmem>>, %arg12: memref<1x4x16xf32, #tpu.memory_space<vmem>>, %arg13: memref<32x384xbf16, #tpu.memory_space<vmem>>, %arg14: memref<32x384xbf16, #tpu.memory_space<vmem>>) attributes {dimension_semantics = [#tpu.dimension_semantics<parallel>], iteration_bounds = array<i64: 2>, scalar_prefetch = 0 : i64, scratch_operands = 2 : i64, tpu.core_type = #tpu.core_type<tc>, window_params = [{transform_indices = @transform_0, window_bounds = array<i64: 1, 4, 16>}, {pipeline_mode = #tpu.pipeline_mode<synchronous>, transform_indices = @transform_1, window_bounds = array<i64: 5, 32, 4>}, {pipeline_mode = #tpu.pipeline_mode<synchronous>, transform_indices = @transform_2, window_bounds = array<i64: 32, 1>}, {pipeline_mode = #tpu.pipeline_mode<synchronous>, transform_indices = @transform_3, window_bounds = array<i64: 5, 32, 32>}, {pipeline_mode = #tpu.pipeline_mode<synchronous>, transform_indices = @transform_4, window_bounds = array<i64: 32, 1>}, {pipeline_mode = #tpu.pipeline_mode<synchronous>, transform_indices = @transform_5, window_bounds = array<i64: 5, 32, 32>}, {pipeline_mode = #tpu.pipeline_mode<synchronous>, transform_indices = @transform_6, window_bounds = array<i64: 32, 1>}, {pipeline_mode = #tpu.pipeline_mode<synchronous>, transform_indices = @transform_7, window_bounds = array<i64: 5, 32, 32>}, {pipeline_mode = #tpu.pipeline_mode<synchronous>, transform_indices = @transform_8, window_bounds = array<i64: 32, 1>}, {pipeline_mode = #tpu.pipeline_mode<synchronous>, transform_indices = @transform_9, window_bounds = array<i64: 5, 4, 32>}, {pipeline_mode = #tpu.pipeline_mode<synchronous>, transform_indices = @transform_10, window_bounds = array<i64: 4, 1>}, {transform_indices = @transform_11, window_bounds = array<i64: 1, 4, 16>}]} {
    %cst = arith.constant 0.000000e+00 : bf16
    %0 = vector.broadcast %cst : bf16 to vector<32x2xbf16>
    %c0 = arith.constant 0 : index
    %c126 = arith.constant 126 : index
    %1 = vector.load %arg13[%c0, %c126] : memref<32x384xbf16, #tpu.memory_space<vmem>>, vector<32x2xbf16>
    tpu.vector_store %arg13[%c0, %c126], %0 {strides = array<i32>} : memref<32x384xbf16, #tpu.memory_space<vmem>>, vector<32x2xbf16>,
    %c0_0 = arith.constant 0 : index
    %c126_1 = arith.constant 126 : index
    %2 = vector.load %arg14[%c0_0, %c126_1] : memref<32x384xbf16, #tpu.memory_space<vmem>>, vector<32x2xbf16>
    tpu.vector_store %arg14[%c0_0, %c126_1], %0 {strides = array<i32>} : memref<32x384xbf16, #tpu.memory_space<vmem>>, vector<32x2xbf16>,
    %c0_2 = arith.constant 0 : index
    %c256 = arith.constant 256 : index
    %3 = vector.load %arg13[%c0_2, %c256] : memref<32x384xbf16, #tpu.memory_space<vmem>>, vector<32x2xbf16>
    tpu.vector_store %arg13[%c0_2, %c256], %0 {strides = array<i32>} : memref<32x384xbf16, #tpu.memory_space<vmem>>, vector<32x2xbf16>,
    %c0_3 = arith.constant 0 : index
    %c256_4 = arith.constant 256 : index
    %4 = vector.load %arg14[%c0_3, %c256_4] : memref<32x384xbf16, #tpu.memory_space<vmem>>, vector<32x2xbf16>
    tpu.vector_store %arg14[%c0_3, %c256_4], %0 {strides = array<i32>} : memref<32x384xbf16, #tpu.memory_space<vmem>>, vector<32x2xbf16>,
    %c0_5 = arith.constant 0 : index
    %c0_6 = arith.constant 0 : index
    %c0_7 = arith.constant 0 : index
    %5 = vector.load %arg1[%c0_5, %c0_6, %c0_7] : memref<1x4x16xf32, #tpu.memory_space<vmem>>, vector<1x4x16xf32>
    %6 = vector.shape_cast %5 : vector<1x4x16xf32> to vector<4x16xf32>
    %7 = arith.truncf %6 : vector<4x16xf32> to vector<4x16xbf16>
    %c0_8 = arith.constant 0 : index
    %c128 = arith.constant 128 : index
    %8 = vector.load %arg13[%c0_8, %c128] : memref<32x384xbf16, #tpu.memory_space<vmem>>, vector<4x16xbf16>
    tpu.vector_store %arg13[%c0_8, %c128], %7 {strides = array<i32>} : memref<32x384xbf16, #tpu.memory_space<vmem>>, vector<4x16xbf16>,
    %c0_9 = arith.constant 0 : index
    %c144 = arith.constant 144 : index
    %9 = vector.load %arg13[%c0_9, %c144] : memref<32x384xbf16, #tpu.memory_space<vmem>>, vector<32x2xbf16>
    tpu.vector_store %arg13[%c0_9, %c144], %0 {strides = array<i32>} : memref<32x384xbf16, #tpu.memory_space<vmem>>, vector<32x2xbf16>,
    %cst_10 = arith.constant 0.000000e+00 : f32
    %10 = vector.broadcast %cst_10 : f32 to vector<32x128xf32>
    %c0_11 = arith.constant 0 : index
    %c126_12 = arith.constant 126 : index
    %11 = vector.load %arg13[%c0_11, %c126_12] : memref<32x384xbf16, #tpu.memory_space<vmem>>, vector<4x128xbf16>
    %c0_13 = arith.constant 0 : index
    %c0_14 = arith.constant 0 : index
    %c0_15 = arith.constant 0 : index
    %12 = vector.load %arg2[%c0_13, %c0_14, %c0_15] : memref<5x32x4xbf16, #tpu.memory_space<vmem>>, vector<1x32x4xbf16>
    %13 = vector.shape_cast %12 : vector<1x32x4xbf16> to vector<32x4xbf16>
    %cst_16 = arith.constant dense<0.000000e+00> : vector<32x128xf32>
    %14 = tpu.matmul %13, %11, %cst_16 {dimension_numbers = #tpu.dot_dimension_numbers<[1], [0], [0], [1], [0, 0, 1, 1], [], []>} : vector<32x4xbf16>, vector<4x128xbf16>, vector<32x128xf32> -> vector<32x128xf32>
    %15 = arith.addf %10, %14 : vector<32x128xf32>
    %c0_17 = arith.constant 0 : index
    %c127 = arith.constant 127 : index
    %16 = vector.load %arg13[%c0_17, %c127] : memref<32x384xbf16, #tpu.memory_space<vmem>>, vector<4x128xbf16>
    %c1 = arith.constant 1 : index
    %c0_18 = arith.constant 0 : index
    %c0_19 = arith.constant 0 : index
    %17 = vector.load %arg2[%c1, %c0_18, %c0_19] : memref<5x32x4xbf16, #tpu.memory_space<vmem>>, vector<1x32x4xbf16>
    %18 = vector.shape_cast %17 : vector<1x32x4xbf16> to vector<32x4xbf16>
    %cst_20 = arith.constant dense<0.000000e+00> : vector<32x128xf32>
    %19 = tpu.matmul %18, %16, %cst_20 {dimension_numbers = #tpu.dot_dimension_numbers<[1], [0], [0], [1], [0, 0, 1, 1], [], []>} : vector<32x4xbf16>, vector<4x128xbf16>, vector<32x128xf32> -> vector<32x128xf32>
    %20 = arith.addf %15, %19 : vector<32x128xf32>
    %c0_21 = arith.constant 0 : index
    %c128_22 = arith.constant 128 : index
    %21 = vector.load %arg13[%c0_21, %c128_22] : memref<32x384xbf16, #tpu.memory_space<vmem>>, vector<4x128xbf16>
    %c2 = arith.constant 2 : index
    %c0_23 = arith.constant 0 : index
    %c0_24 = arith.constant 0 : index
    %22 = vector.load %arg2[%c2, %c0_23, %c0_24] : memref<5x32x4xbf16, #tpu.memory_space<vmem>>, vector<1x32x4xbf16>
    %23 = vector.shape_cast %22 : vector<1x32x4xbf16> to vector<32x4xbf16>
    %cst_25 = arith.constant dense<0.000000e+00> : vector<32x128xf32>
    %24 = tpu.matmul %23, %21, %cst_25 {dimension_numbers = #tpu.dot_dimension_numbers<[1], [0], [0], [1], [0, 0, 1, 1], [], []>} : vector<32x4xbf16>, vector<4x128xbf16>, vector<32x128xf32> -> vector<32x128xf32>
    %25 = arith.addf %20, %24 : vector<32x128xf32>
    %c0_26 = arith.constant 0 : index
    %c129 = arith.constant 129 : index
    %26 = vector.load %arg13[%c0_26, %c129] : memref<32x384xbf16, #tpu.memory_space<vmem>>, vector<4x128xbf16>
    %c3 = arith.constant 3 : index
    %c0_27 = arith.constant 0 : index
    %c0_28 = arith.constant 0 : index
    %27 = vector.load %arg2[%c3, %c0_27, %c0_28] : memref<5x32x4xbf16, #tpu.memory_space<vmem>>, vector<1x32x4xbf16>
    %28 = vector.shape_cast %27 : vector<1x32x4xbf16> to vector<32x4xbf16>
    %cst_29 = arith.constant dense<0.000000e+00> : vector<32x128xf32>
    %29 = tpu.matmul %28, %26, %cst_29 {dimension_numbers = #tpu.dot_dimension_numbers<[1], [0], [0], [1], [0, 0, 1, 1], [], []>} : vector<32x4xbf16>, vector<4x128xbf16>, vector<32x128xf32> -> vector<32x128xf32>
    %30 = arith.addf %25, %29 : vector<32x128xf32>
    %c0_30 = arith.constant 0 : index
    %c130 = arith.constant 130 : index
    %31 = vector.load %arg13[%c0_30, %c130] : memref<32x384xbf16, #tpu.memory_space<vmem>>, vector<4x128xbf16>
    %c4 = arith.constant 4 : index
    %c0_31 = arith.constant 0 : index
    %c0_32 = arith.constant 0 : index
    %32 = vector.load %arg2[%c4, %c0_31, %c0_32] : memref<5x32x4xbf16, #tpu.memory_space<vmem>>, vector<1x32x4xbf16>
    %33 = vector.shape_cast %32 : vector<1x32x4xbf16> to vector<32x4xbf16>
    %cst_33 = arith.constant dense<0.000000e+00> : vector<32x128xf32>
    %34 = tpu.matmul %33, %31, %cst_33 {dimension_numbers = #tpu.dot_dimension_numbers<[1], [0], [0], [1], [0, 0, 1, 1], [], []>} : vector<32x4xbf16>, vector<4x128xbf16>, vector<32x128xf32> -> vector<32x128xf32>
    %35 = arith.addf %30, %34 : vector<32x128xf32>
    %c0_34 = arith.constant 0 : index
    %c0_35 = arith.constant 0 : index
    %36 = vector.load %arg3[%c0_34, %c0_35] : memref<32x1xf32, #tpu.memory_space<vmem>>, vector<32x1xf32>
    %37 = vector.broadcast %36 : vector<32x1xf32> to vector<32x128xf32>
    %38 = arith.addf %35, %37 : vector<32x128xf32>
    %39 = math.tanh %38 : vector<32x128xf32>
    %40 = arith.truncf %39 : vector<32x128xf32> to vector<32x128xbf16>
    %c0_36 = arith.constant 0 : index
    %c128_37 = arith.constant 128 : index
    %41 = vector.load %arg14[%c0_36, %c128_37] : memref<32x384xbf16, #tpu.memory_space<vmem>>, vector<32x128xbf16>
    tpu.vector_store %arg14[%c0_36, %c128_37], %40 {strides = array<i32>} : memref<32x384xbf16, #tpu.memory_space<vmem>>, vector<32x128xbf16>,
    %c0_38 = arith.constant 0 : index
    %c144_39 = arith.constant 144 : index
    %42 = vector.load %arg14[%c0_38, %c144_39] : memref<32x384xbf16, #tpu.memory_space<vmem>>, vector<32x2xbf16>
    tpu.vector_store %arg14[%c0_38, %c144_39], %0 {strides = array<i32>} : memref<32x384xbf16, #tpu.memory_space<vmem>>, vector<32x2xbf16>,
    %cst_40 = arith.constant 0.000000e+00 : f32
    %43 = vector.broadcast %cst_40 : f32 to vector<32x128xf32>
    %c0_41 = arith.constant 0 : index
    %c126_42 = arith.constant 126 : index
    %44 = vector.load %arg14[%c0_41, %c126_42] : memref<32x384xbf16, #tpu.memory_space<vmem>>, vector<32x128xbf16>
    %c0_43 = arith.constant 0 : index
    %c0_44 = arith.constant 0 : index
    %c0_45 = arith.constant 0 : index
    %45 = vector.load %arg4[%c0_43, %c0_44, %c0_45] : memref<5x32x32xbf16, #tpu.memory_space<vmem>>, vector<1x32x32xbf16>
    %46 = vector.shape_cast %45 : vector<1x32x32xbf16> to vector<32x32xbf16>
    %cst_46 = arith.constant dense<0.000000e+00> : vector<32x128xf32>
    %47 = tpu.matmul %46, %44, %cst_46 {dimension_numbers = #tpu.dot_dimension_numbers<[1], [0], [0], [1], [0, 0, 1, 1], [], []>} : vector<32x32xbf16>, vector<32x128xbf16>, vector<32x128xf32> -> vector<32x128xf32>
    %48 = arith.addf %43, %47 : vector<32x128xf32>
    %c0_47 = arith.constant 0 : index
    %c127_48 = arith.constant 127 : index
    %49 = vector.load %arg14[%c0_47, %c127_48] : memref<32x384xbf16, #tpu.memory_space<vmem>>, vector<32x128xbf16>
    %c1_49 = arith.constant 1 : index
    %c0_50 = arith.constant 0 : index
    %c0_51 = arith.constant 0 : index
    %50 = vector.load %arg4[%c1_49, %c0_50, %c0_51] : memref<5x32x32xbf16, #tpu.memory_space<vmem>>, vector<1x32x32xbf16>
    %51 = vector.shape_cast %50 : vector<1x32x32xbf16> to vector<32x32xbf16>
    %cst_52 = arith.constant dense<0.000000e+00> : vector<32x128xf32>
    %52 = tpu.matmul %51, %49, %cst_52 {dimension_numbers = #tpu.dot_dimension_numbers<[1], [0], [0], [1], [0, 0, 1, 1], [], []>} : vector<32x32xbf16>, vector<32x128xbf16>, vector<32x128xf32> -> vector<32x128xf32>
    %53 = arith.addf %48, %52 : vector<32x128xf32>
    %c0_53 = arith.constant 0 : index
    %c128_54 = arith.constant 128 : index
    %54 = vector.load %arg14[%c0_53, %c128_54] : memref<32x384xbf16, #tpu.memory_space<vmem>>, vector<32x128xbf16>
    %c2_55 = arith.constant 2 : index
    %c0_56 = arith.constant 0 : index
    %c0_57 = arith.constant 0 : index
    %55 = vector.load %arg4[%c2_55, %c0_56, %c0_57] : memref<5x32x32xbf16, #tpu.memory_space<vmem>>, vector<1x32x32xbf16>
    %56 = vector.shape_cast %55 : vector<1x32x32xbf16> to vector<32x32xbf16>
    %cst_58 = arith.constant dense<0.000000e+00> : vector<32x128xf32>
    %57 = tpu.matmul %56, %54, %cst_58 {dimension_numbers = #tpu.dot_dimension_numbers<[1], [0], [0], [1], [0, 0, 1, 1], [], []>} : vector<32x32xbf16>, vector<32x128xbf16>, vector<32x128xf32> -> vector<32x128xf32>
    %58 = arith.addf %53, %57 : vector<32x128xf32>
    %c0_59 = arith.constant 0 : index
    %c129_60 = arith.constant 129 : index
    %59 = vector.load %arg14[%c0_59, %c129_60] : memref<32x384xbf16, #tpu.memory_space<vmem>>, vector<32x128xbf16>
    %c3_61 = arith.constant 3 : index
    %c0_62 = arith.constant 0 : index
    %c0_63 = arith.constant 0 : index
    %60 = vector.load %arg4[%c3_61, %c0_62, %c0_63] : memref<5x32x32xbf16, #tpu.memory_space<vmem>>, vector<1x32x32xbf16>
    %61 = vector.shape_cast %60 : vector<1x32x32xbf16> to vector<32x32xbf16>
    %cst_64 = arith.constant dense<0.000000e+00> : vector<32x128xf32>
    %62 = tpu.matmul %61, %59, %cst_64 {dimension_numbers = #tpu.dot_dimension_numbers<[1], [0], [0], [1], [0, 0, 1, 1], [], []>} : vector<32x32xbf16>, vector<32x128xbf16>, vector<32x128xf32> -> vector<32x128xf32>
    %63 = arith.addf %58, %62 : vector<32x128xf32>
    %c0_65 = arith.constant 0 : index
    %c130_66 = arith.constant 130 : index
    %64 = vector.load %arg14[%c0_65, %c130_66] : memref<32x384xbf16, #tpu.memory_space<vmem>>, vector<32x128xbf16>
    %c4_67 = arith.constant 4 : index
    %c0_68 = arith.constant 0 : index
    %c0_69 = arith.constant 0 : index
    %65 = vector.load %arg4[%c4_67, %c0_68, %c0_69] : memref<5x32x32xbf16, #tpu.memory_space<vmem>>, vector<1x32x32xbf16>
    %66 = vector.shape_cast %65 : vector<1x32x32xbf16> to vector<32x32xbf16>
    %cst_70 = arith.constant dense<0.000000e+00> : vector<32x128xf32>
    %67 = tpu.matmul %66, %64, %cst_70 {dimension_numbers = #tpu.dot_dimension_numbers<[1], [0], [0], [1], [0, 0, 1, 1], [], []>} : vector<32x32xbf16>, vector<32x128xbf16>, vector<32x128xf32> -> vector<32x128xf32>
    %68 = arith.addf %63, %67 : vector<32x128xf32>
    %c0_71 = arith.constant 0 : index
    %c0_72 = arith.constant 0 : index
    %69 = vector.load %arg5[%c0_71, %c0_72] : memref<32x1xf32, #tpu.memory_space<vmem>>, vector<32x1xf32>
    %70 = vector.broadcast %69 : vector<32x1xf32> to vector<32x128xf32>
    %71 = arith.addf %68, %70 : vector<32x128xf32>
    %72 = math.tanh %71 : vector<32x128xf32>
    %73 = arith.truncf %72 : vector<32x128xf32> to vector<32x128xbf16>
    %c0_73 = arith.constant 0 : index
    %c128_74 = arith.constant 128 : index
    %74 = vector.load %arg13[%c0_73, %c128_74] : memref<32x384xbf16, #tpu.memory_space<vmem>>, vector<32x128xbf16>
    tpu.vector_store %arg13[%c0_73, %c128_74], %73 {strides = array<i32>} : memref<32x384xbf16, #tpu.memory_space<vmem>>, vector<32x128xbf16>,
    %c0_75 = arith.constant 0 : index
    %c144_76 = arith.constant 144 : index
    %75 = vector.load %arg13[%c0_75, %c144_76] : memref<32x384xbf16, #tpu.memory_space<vmem>>, vector<32x2xbf16>
    tpu.vector_store %arg13[%c0_75, %c144_76], %0 {strides = array<i32>} : memref<32x384xbf16, #tpu.memory_space<vmem>>, vector<32x2xbf16>,
    %cst_77 = arith.constant 0.000000e+00 : f32
    %76 = vector.broadcast %cst_77 : f32 to vector<32x128xf32>
    %c0_78 = arith.constant 0 : index
    %c126_79 = arith.constant 126 : index
    %77 = vector.load %arg13[%c0_78, %c126_79] : memref<32x384xbf16, #tpu.memory_space<vmem>>, vector<32x128xbf16>
    %c0_80 = arith.constant 0 : index
    %c0_81 = arith.constant 0 : index
    %c0_82 = arith.constant 0 : index
    %78 = vector.load %arg6[%c0_80, %c0_81, %c0_82] : memref<5x32x32xbf16, #tpu.memory_space<vmem>>, vector<1x32x32xbf16>
    %79 = vector.shape_cast %78 : vector<1x32x32xbf16> to vector<32x32xbf16>
    %cst_83 = arith.constant dense<0.000000e+00> : vector<32x128xf32>
    %80 = tpu.matmul %79, %77, %cst_83 {dimension_numbers = #tpu.dot_dimension_numbers<[1], [0], [0], [1], [0, 0, 1, 1], [], []>} : vector<32x32xbf16>, vector<32x128xbf16>, vector<32x128xf32> -> vector<32x128xf32>
    %81 = arith.addf %76, %80 : vector<32x128xf32>
    %c0_84 = arith.constant 0 : index
    %c127_85 = arith.constant 127 : index
    %82 = vector.load %arg13[%c0_84, %c127_85] : memref<32x384xbf16, #tpu.memory_space<vmem>>, vector<32x128xbf16>
    %c1_86 = arith.constant 1 : index
    %c0_87 = arith.constant 0 : index
    %c0_88 = arith.constant 0 : index
    %83 = vector.load %arg6[%c1_86, %c0_87, %c0_88] : memref<5x32x32xbf16, #tpu.memory_space<vmem>>, vector<1x32x32xbf16>
    %84 = vector.shape_cast %83 : vector<1x32x32xbf16> to vector<32x32xbf16>
    %cst_89 = arith.constant dense<0.000000e+00> : vector<32x128xf32>
    %85 = tpu.matmul %84, %82, %cst_89 {dimension_numbers = #tpu.dot_dimension_numbers<[1], [0], [0], [1], [0, 0, 1, 1], [], []>} : vector<32x32xbf16>, vector<32x128xbf16>, vector<32x128xf32> -> vector<32x128xf32>
    %86 = arith.addf %81, %85 : vector<32x128xf32>
    %c0_90 = arith.constant 0 : index
    %c128_91 = arith.constant 128 : index
    %87 = vector.load %arg13[%c0_90, %c128_91] : memref<32x384xbf16, #tpu.memory_space<vmem>>, vector<32x128xbf16>
    %c2_92 = arith.constant 2 : index
    %c0_93 = arith.constant 0 : index
    %c0_94 = arith.constant 0 : index
    %88 = vector.load %arg6[%c2_92, %c0_93, %c0_94] : memref<5x32x32xbf16, #tpu.memory_space<vmem>>, vector<1x32x32xbf16>
    %89 = vector.shape_cast %88 : vector<1x32x32xbf16> to vector<32x32xbf16>
    %cst_95 = arith.constant dense<0.000000e+00> : vector<32x128xf32>
    %90 = tpu.matmul %89, %87, %cst_95 {dimension_numbers = #tpu.dot_dimension_numbers<[1], [0], [0], [1], [0, 0, 1, 1], [], []>} : vector<32x32xbf16>, vector<32x128xbf16>, vector<32x128xf32> -> vector<32x128xf32>
    %91 = arith.addf %86, %90 : vector<32x128xf32>
    %c0_96 = arith.constant 0 : index
    %c129_97 = arith.constant 129 : index
    %92 = vector.load %arg13[%c0_96, %c129_97] : memref<32x384xbf16, #tpu.memory_space<vmem>>, vector<32x128xbf16>
    %c3_98 = arith.constant 3 : index
    %c0_99 = arith.constant 0 : index
    %c0_100 = arith.constant 0 : index
    %93 = vector.load %arg6[%c3_98, %c0_99, %c0_100] : memref<5x32x32xbf16, #tpu.memory_space<vmem>>, vector<1x32x32xbf16>
    %94 = vector.shape_cast %93 : vector<1x32x32xbf16> to vector<32x32xbf16>
    %cst_101 = arith.constant dense<0.000000e+00> : vector<32x128xf32>
    %95 = tpu.matmul %94, %92, %cst_101 {dimension_numbers = #tpu.dot_dimension_numbers<[1], [0], [0], [1], [0, 0, 1, 1], [], []>} : vector<32x32xbf16>, vector<32x128xbf16>, vector<32x128xf32> -> vector<32x128xf32>
    %96 = arith.addf %91, %95 : vector<32x128xf32>
    %c0_102 = arith.constant 0 : index
    %c130_103 = arith.constant 130 : index
    %97 = vector.load %arg13[%c0_102, %c130_103] : memref<32x384xbf16, #tpu.memory_space<vmem>>, vector<32x128xbf16>
    %c4_104 = arith.constant 4 : index
    %c0_105 = arith.constant 0 : index
    %c0_106 = arith.constant 0 : index
    %98 = vector.load %arg6[%c4_104, %c0_105, %c0_106] : memref<5x32x32xbf16, #tpu.memory_space<vmem>>, vector<1x32x32xbf16>
    %99 = vector.shape_cast %98 : vector<1x32x32xbf16> to vector<32x32xbf16>
    %cst_107 = arith.constant dense<0.000000e+00> : vector<32x128xf32>
    %100 = tpu.matmul %99, %97, %cst_107 {dimension_numbers = #tpu.dot_dimension_numbers<[1], [0], [0], [1], [0, 0, 1, 1], [], []>} : vector<32x32xbf16>, vector<32x128xbf16>, vector<32x128xf32> -> vector<32x128xf32>
    %101 = arith.addf %96, %100 : vector<32x128xf32>
    %c0_108 = arith.constant 0 : index
    %c0_109 = arith.constant 0 : index
    %102 = vector.load %arg7[%c0_108, %c0_109] : memref<32x1xf32, #tpu.memory_space<vmem>>, vector<32x1xf32>
    %103 = vector.broadcast %102 : vector<32x1xf32> to vector<32x128xf32>
    %104 = arith.addf %101, %103 : vector<32x128xf32>
    %105 = math.tanh %104 : vector<32x128xf32>
    %106 = arith.truncf %105 : vector<32x128xf32> to vector<32x128xbf16>
    %c0_110 = arith.constant 0 : index
    %c128_111 = arith.constant 128 : index
    %107 = vector.load %arg14[%c0_110, %c128_111] : memref<32x384xbf16, #tpu.memory_space<vmem>>, vector<32x128xbf16>
    tpu.vector_store %arg14[%c0_110, %c128_111], %106 {strides = array<i32>} : memref<32x384xbf16, #tpu.memory_space<vmem>>, vector<32x128xbf16>,
    %c0_112 = arith.constant 0 : index
    %c144_113 = arith.constant 144 : index
    %108 = vector.load %arg14[%c0_112, %c144_113] : memref<32x384xbf16, #tpu.memory_space<vmem>>, vector<32x2xbf16>
    tpu.vector_store %arg14[%c0_112, %c144_113], %0 {strides = array<i32>} : memref<32x384xbf16, #tpu.memory_space<vmem>>, vector<32x2xbf16>,
    %cst_114 = arith.constant 0.000000e+00 : f32
    %109 = vector.broadcast %cst_114 : f32 to vector<32x128xf32>
    %c0_115 = arith.constant 0 : index
    %c126_116 = arith.constant 126 : index
    %110 = vector.load %arg14[%c0_115, %c126_116] : memref<32x384xbf16, #tpu.memory_space<vmem>>, vector<32x128xbf16>
    %c0_117 = arith.constant 0 : index
    %c0_118 = arith.constant 0 : index
    %c0_119 = arith.constant 0 : index
    %111 = vector.load %arg8[%c0_117, %c0_118, %c0_119] : memref<5x32x32xbf16, #tpu.memory_space<vmem>>, vector<1x32x32xbf16>
    %112 = vector.shape_cast %111 : vector<1x32x32xbf16> to vector<32x32xbf16>
    %cst_120 = arith.constant dense<0.000000e+00> : vector<32x128xf32>
    %113 = tpu.matmul %112, %110, %cst_120 {dimension_numbers = #tpu.dot_dimension_numbers<[1], [0], [0], [1], [0, 0, 1, 1], [], []>} : vector<32x32xbf16>, vector<32x128xbf16>, vector<32x128xf32> -> vector<32x128xf32>
    %114 = arith.addf %109, %113 : vector<32x128xf32>
    %c0_121 = arith.constant 0 : index
    %c127_122 = arith.constant 127 : index
    %115 = vector.load %arg14[%c0_121, %c127_122] : memref<32x384xbf16, #tpu.memory_space<vmem>>, vector<32x128xbf16>
    %c1_123 = arith.constant 1 : index
    %c0_124 = arith.constant 0 : index
    %c0_125 = arith.constant 0 : index
    %116 = vector.load %arg8[%c1_123, %c0_124, %c0_125] : memref<5x32x32xbf16, #tpu.memory_space<vmem>>, vector<1x32x32xbf16>
    %117 = vector.shape_cast %116 : vector<1x32x32xbf16> to vector<32x32xbf16>
    %cst_126 = arith.constant dense<0.000000e+00> : vector<32x128xf32>
    %118 = tpu.matmul %117, %115, %cst_126 {dimension_numbers = #tpu.dot_dimension_numbers<[1], [0], [0], [1], [0, 0, 1, 1], [], []>} : vector<32x32xbf16>, vector<32x128xbf16>, vector<32x128xf32> -> vector<32x128xf32>
    %119 = arith.addf %114, %118 : vector<32x128xf32>
    %c0_127 = arith.constant 0 : index
    %c128_128 = arith.constant 128 : index
    %120 = vector.load %arg14[%c0_127, %c128_128] : memref<32x384xbf16, #tpu.memory_space<vmem>>, vector<32x128xbf16>
    %c2_129 = arith.constant 2 : index
    %c0_130 = arith.constant 0 : index
    %c0_131 = arith.constant 0 : index
    %121 = vector.load %arg8[%c2_129, %c0_130, %c0_131] : memref<5x32x32xbf16, #tpu.memory_space<vmem>>, vector<1x32x32xbf16>
    %122 = vector.shape_cast %121 : vector<1x32x32xbf16> to vector<32x32xbf16>
    %cst_132 = arith.constant dense<0.000000e+00> : vector<32x128xf32>
    %123 = tpu.matmul %122, %120, %cst_132 {dimension_numbers = #tpu.dot_dimension_numbers<[1], [0], [0], [1], [0, 0, 1, 1], [], []>} : vector<32x32xbf16>, vector<32x128xbf16>, vector<32x128xf32> -> vector<32x128xf32>
    %124 = arith.addf %119, %123 : vector<32x128xf32>
    %c0_133 = arith.constant 0 : index
    %c129_134 = arith.constant 129 : index
    %125 = vector.load %arg14[%c0_133, %c129_134] : memref<32x384xbf16, #tpu.memory_space<vmem>>, vector<32x128xbf16>
    %c3_135 = arith.constant 3 : index
    %c0_136 = arith.constant 0 : index
    %c0_137 = arith.constant 0 : index
    %126 = vector.load %arg8[%c3_135, %c0_136, %c0_137] : memref<5x32x32xbf16, #tpu.memory_space<vmem>>, vector<1x32x32xbf16>
    %127 = vector.shape_cast %126 : vector<1x32x32xbf16> to vector<32x32xbf16>
    %cst_138 = arith.constant dense<0.000000e+00> : vector<32x128xf32>
    %128 = tpu.matmul %127, %125, %cst_138 {dimension_numbers = #tpu.dot_dimension_numbers<[1], [0], [0], [1], [0, 0, 1, 1], [], []>} : vector<32x32xbf16>, vector<32x128xbf16>, vector<32x128xf32> -> vector<32x128xf32>
    %129 = arith.addf %124, %128 : vector<32x128xf32>
    %c0_139 = arith.constant 0 : index
    %c130_140 = arith.constant 130 : index
    %130 = vector.load %arg14[%c0_139, %c130_140] : memref<32x384xbf16, #tpu.memory_space<vmem>>, vector<32x128xbf16>
    %c4_141 = arith.constant 4 : index
    %c0_142 = arith.constant 0 : index
    %c0_143 = arith.constant 0 : index
    %131 = vector.load %arg8[%c4_141, %c0_142, %c0_143] : memref<5x32x32xbf16, #tpu.memory_space<vmem>>, vector<1x32x32xbf16>
    %132 = vector.shape_cast %131 : vector<1x32x32xbf16> to vector<32x32xbf16>
    %cst_144 = arith.constant dense<0.000000e+00> : vector<32x128xf32>
    %133 = tpu.matmul %132, %130, %cst_144 {dimension_numbers = #tpu.dot_dimension_numbers<[1], [0], [0], [1], [0, 0, 1, 1], [], []>} : vector<32x32xbf16>, vector<32x128xbf16>, vector<32x128xf32> -> vector<32x128xf32>
    %134 = arith.addf %129, %133 : vector<32x128xf32>
    %c0_145 = arith.constant 0 : index
    %c0_146 = arith.constant 0 : index
    %135 = vector.load %arg9[%c0_145, %c0_146] : memref<32x1xf32, #tpu.memory_space<vmem>>, vector<32x1xf32>
    %136 = vector.broadcast %135 : vector<32x1xf32> to vector<32x128xf32>
    %137 = arith.addf %134, %136 : vector<32x128xf32>
    %138 = math.tanh %137 : vector<32x128xf32>
    %139 = arith.truncf %138 : vector<32x128xf32> to vector<32x128xbf16>
    %c0_147 = arith.constant 0 : index
    %c128_148 = arith.constant 128 : index
    %140 = vector.load %arg13[%c0_147, %c128_148] : memref<32x384xbf16, #tpu.memory_space<vmem>>, vector<32x128xbf16>
    tpu.vector_store %arg13[%c0_147, %c128_148], %139 {strides = array<i32>} : memref<32x384xbf16, #tpu.memory_space<vmem>>, vector<32x128xbf16>,
    %c0_149 = arith.constant 0 : index
    %c144_150 = arith.constant 144 : index
    %141 = vector.load %arg13[%c0_149, %c144_150] : memref<32x384xbf16, #tpu.memory_space<vmem>>, vector<32x2xbf16>
    tpu.vector_store %arg13[%c0_149, %c144_150], %0 {strides = array<i32>} : memref<32x384xbf16, #tpu.memory_space<vmem>>, vector<32x2xbf16>,
    %cst_151 = arith.constant 0.000000e+00 : f32
    %142 = vector.broadcast %cst_151 : f32 to vector<4x128xf32>
    %c0_152 = arith.constant 0 : index
    %c126_153 = arith.constant 126 : index
    %143 = vector.load %arg13[%c0_152, %c126_153] : memref<32x384xbf16, #tpu.memory_space<vmem>>, vector<32x128xbf16>
    %c0_154 = arith.constant 0 : index
    %c0_155 = arith.constant 0 : index
    %c0_156 = arith.constant 0 : index
    %144 = vector.load %arg10[%c0_154, %c0_155, %c0_156] : memref<5x4x32xbf16, #tpu.memory_space<vmem>>, vector<1x4x32xbf16>
    %145 = vector.shape_cast %144 : vector<1x4x32xbf16> to vector<4x32xbf16>
    %cst_157 = arith.constant dense<0.000000e+00> : vector<4x128xf32>
    %146 = tpu.matmul %145, %143, %cst_157 {dimension_numbers = #tpu.dot_dimension_numbers<[1], [0], [0], [1], [0, 0, 1, 1], [], []>} : vector<4x32xbf16>, vector<32x128xbf16>, vector<4x128xf32> -> vector<4x128xf32>
    %147 = arith.addf %142, %146 : vector<4x128xf32>
    %c0_158 = arith.constant 0 : index
    %c127_159 = arith.constant 127 : index
    %148 = vector.load %arg13[%c0_158, %c127_159] : memref<32x384xbf16, #tpu.memory_space<vmem>>, vector<32x128xbf16>
    %c1_160 = arith.constant 1 : index
    %c0_161 = arith.constant 0 : index
    %c0_162 = arith.constant 0 : index
    %149 = vector.load %arg10[%c1_160, %c0_161, %c0_162] : memref<5x4x32xbf16, #tpu.memory_space<vmem>>, vector<1x4x32xbf16>
    %150 = vector.shape_cast %149 : vector<1x4x32xbf16> to vector<4x32xbf16>
    %cst_163 = arith.constant dense<0.000000e+00> : vector<4x128xf32>
    %151 = tpu.matmul %150, %148, %cst_163 {dimension_numbers = #tpu.dot_dimension_numbers<[1], [0], [0], [1], [0, 0, 1, 1], [], []>} : vector<4x32xbf16>, vector<32x128xbf16>, vector<4x128xf32> -> vector<4x128xf32>
    %152 = arith.addf %147, %151 : vector<4x128xf32>
    %c0_164 = arith.constant 0 : index
    %c128_165 = arith.constant 128 : index
    %153 = vector.load %arg13[%c0_164, %c128_165] : memref<32x384xbf16, #tpu.memory_space<vmem>>, vector<32x128xbf16>
    %c2_166 = arith.constant 2 : index
    %c0_167 = arith.constant 0 : index
    %c0_168 = arith.constant 0 : index
    %154 = vector.load %arg10[%c2_166, %c0_167, %c0_168] : memref<5x4x32xbf16, #tpu.memory_space<vmem>>, vector<1x4x32xbf16>
    %155 = vector.shape_cast %154 : vector<1x4x32xbf16> to vector<4x32xbf16>
    %cst_169 = arith.constant dense<0.000000e+00> : vector<4x128xf32>
    %156 = tpu.matmul %155, %153, %cst_169 {dimension_numbers = #tpu.dot_dimension_numbers<[1], [0], [0], [1], [0, 0, 1, 1], [], []>} : vector<4x32xbf16>, vector<32x128xbf16>, vector<4x128xf32> -> vector<4x128xf32>
    %157 = arith.addf %152, %156 : vector<4x128xf32>
    %c0_170 = arith.constant 0 : index
    %c129_171 = arith.constant 129 : index
    %158 = vector.load %arg13[%c0_170, %c129_171] : memref<32x384xbf16, #tpu.memory_space<vmem>>, vector<32x128xbf16>
    %c3_172 = arith.constant 3 : index
    %c0_173 = arith.constant 0 : index
    %c0_174 = arith.constant 0 : index
    %159 = vector.load %arg10[%c3_172, %c0_173, %c0_174] : memref<5x4x32xbf16, #tpu.memory_space<vmem>>, vector<1x4x32xbf16>
    %160 = vector.shape_cast %159 : vector<1x4x32xbf16> to vector<4x32xbf16>
    %cst_175 = arith.constant dense<0.000000e+00> : vector<4x128xf32>
    %161 = tpu.matmul %160, %158, %cst_175 {dimension_numbers = #tpu.dot_dimension_numbers<[1], [0], [0], [1], [0, 0, 1, 1], [], []>} : vector<4x32xbf16>, vector<32x128xbf16>, vector<4x128xf32> -> vector<4x128xf32>
    %162 = arith.addf %157, %161 : vector<4x128xf32>
    %c0_176 = arith.constant 0 : index
    %c130_177 = arith.constant 130 : index
    %163 = vector.load %arg13[%c0_176, %c130_177] : memref<32x384xbf16, #tpu.memory_space<vmem>>, vector<32x128xbf16>
    %c4_178 = arith.constant 4 : index
    %c0_179 = arith.constant 0 : index
    %c0_180 = arith.constant 0 : index
    %164 = vector.load %arg10[%c4_178, %c0_179, %c0_180] : memref<5x4x32xbf16, #tpu.memory_space<vmem>>, vector<1x4x32xbf16>
    %165 = vector.shape_cast %164 : vector<1x4x32xbf16> to vector<4x32xbf16>
    %cst_181 = arith.constant dense<0.000000e+00> : vector<4x128xf32>
    %166 = tpu.matmul %165, %163, %cst_181 {dimension_numbers = #tpu.dot_dimension_numbers<[1], [0], [0], [1], [0, 0, 1, 1], [], []>} : vector<4x32xbf16>, vector<32x128xbf16>, vector<4x128xf32> -> vector<4x128xf32>
    %167 = arith.addf %162, %166 : vector<4x128xf32>
    %c0_182 = arith.constant 0 : index
    %c0_183 = arith.constant 0 : index
    %168 = vector.load %arg11[%c0_182, %c0_183] : memref<4x1xf32, #tpu.memory_space<vmem>>, vector<4x1xf32>
    %169 = vector.broadcast %168 : vector<4x1xf32> to vector<4x128xf32>
    %170 = arith.addf %167, %169 : vector<4x128xf32>
    %171 = vector.extract_strided_slice %170 {offsets = [0, 0], sizes = [4, 16], strides = [1, 1]} : vector<4x128xf32> to vector<4x16xf32>
    %c0_184 = arith.constant 0 : index
    %c0_185 = arith.constant 0 : index
    %c0_186 = arith.constant 0 : index
    %172 = vector.load %arg12[%c0_184, %c0_185, %c0_186] : memref<1x4x16xf32, #tpu.memory_space<vmem>>, vector<1x4x16xf32>
    %173 = vector.shape_cast %172 : vector<1x4x16xf32> to vector<4x16xf32>
    %174 = vector.shape_cast %171 : vector<4x16xf32> to vector<1x4x16xf32>
    tpu.vector_store %arg12[%c0_184, %c0_185, %c0_186], %174 {strides = array<i32>} : memref<1x4x16xf32, #tpu.memory_space<vmem>>, vector<1x4x16xf32>,
    return
  }
  func.func @transform_0(%arg0: i32) -> (i32, i32, i32) {
    %c0_i32 = arith.constant 0 : i32
    %c0_i32_0 = arith.constant 0 : i32
    %c0_i32_1 = arith.constant 0 : i32
    return %arg0, %c0_i32, %c0_i32_0 : i32, i32, i32
  }
  func.func @transform_1(%arg0: i32) -> (i32, i32, i32) {
    %c0_i32 = arith.constant 0 : i32
    %c0_i32_0 = arith.constant 0 : i32
    %c0_i32_1 = arith.constant 0 : i32
    %c0_i32_2 = arith.constant 0 : i32
    return %c0_i32, %c0_i32_0, %c0_i32_1 : i32, i32, i32
  }
  func.func @transform_2(%arg0: i32) -> (i32, i32) {
    %c0_i32 = arith.constant 0 : i32
    %c0_i32_0 = arith.constant 0 : i32
    %c0_i32_1 = arith.constant 0 : i32
    return %c0_i32, %c0_i32_0 : i32, i32
  }
  func.func @transform_3(%arg0: i32) -> (i32, i32, i32) {
    %c0_i32 = arith.constant 0 : i32
    %c0_i32_0 = arith.constant 0 : i32
    %c0_i32_1 = arith.constant 0 : i32
    %c0_i32_2 = arith.constant 0 : i32
    return %c0_i32, %c0_i32_0, %c0_i32_1 : i32, i32, i32
  }
  func.func @transform_4(%arg0: i32) -> (i32, i32) {
    %c0_i32 = arith.constant 0 : i32
    %c0_i32_0 = arith.constant 0 : i32
    %c0_i32_1 = arith.constant 0 : i32
    return %c0_i32, %c0_i32_0 : i32, i32
  }
  func.func @transform_5(%arg0: i32) -> (i32, i32, i32) {
    %c0_i32 = arith.constant 0 : i32
    %c0_i32_0 = arith.constant 0 : i32
    %c0_i32_1 = arith.constant 0 : i32
    %c0_i32_2 = arith.constant 0 : i32
    return %c0_i32, %c0_i32_0, %c0_i32_1 : i32, i32, i32
  }
  func.func @transform_6(%arg0: i32) -> (i32, i32) {
    %c0_i32 = arith.constant 0 : i32
    %c0_i32_0 = arith.constant 0 : i32
    %c0_i32_1 = arith.constant 0 : i32
    return %c0_i32, %c0_i32_0 : i32, i32
  }
  func.func @transform_7(%arg0: i32) -> (i32, i32, i32) {
    %c0_i32 = arith.constant 0 : i32
    %c0_i32_0 = arith.constant 0 : i32
    %c0_i32_1 = arith.constant 0 : i32
    %c0_i32_2 = arith.constant 0 : i32
    return %c0_i32, %c0_i32_0, %c0_i32_1 : i32, i32, i32
  }
  func.func @transform_8(%arg0: i32) -> (i32, i32) {
    %c0_i32 = arith.constant 0 : i32
    %c0_i32_0 = arith.constant 0 : i32
    %c0_i32_1 = arith.constant 0 : i32
    return %c0_i32, %c0_i32_0 : i32, i32
  }
  func.func @transform_9(%arg0: i32) -> (i32, i32, i32) {
    %c0_i32 = arith.constant 0 : i32
    %c0_i32_0 = arith.constant 0 : i32
    %c0_i32_1 = arith.constant 0 : i32
    %c0_i32_2 = arith.constant 0 : i32
    return %c0_i32, %c0_i32_0, %c0_i32_1 : i32, i32, i32
  }
  func.func @transform_10(%arg0: i32) -> (i32, i32) {
    %c0_i32 = arith.constant 0 : i32
    %c0_i32_0 = arith.constant 0 : i32
    %c0_i32_1 = arith.constant 0 : i32
    return %c0_i32, %c0_i32_0 : i32, i32
  }
  func.func @transform_11(%arg0: i32) -> (i32, i32, i32) {
    %c0_i32 = arith.constant 0 : i32
    %c0_i32_0 = arith.constant 0 : i32
    %c0_i32_1 = arith.constant 0 : i32
    return %arg0, %c0_i32, %c0_i32_0 : i32, i32, i32
  }
}

</mosaic_0001>

<bundles_post_ra>
// kernel: tpu_custom_call.1
= control target key start
LH: loop header
LB: loop body
LE: loop exit
PB: predicated region body
PF: predicated region fallthrough
CT: control target
= control target key end

     0   :  { %16 = vsyncpa [#allocation5], 0  ;;  %s4066_s0 = inlined_call_operand.hbm [shape: f32[2,4,16], index: 0, kind: input, shape index: {}]   ;;  %s4067_s1 = inlined_call_operand.vmem [shape: bf16[5,32,4], index: 1, kind: input, shape index: {}]   ;;  %s4068_s2 = inlined_call_operand.vmem [shape: f32[32,1], index: 2, kind: input, shape index: {}]   ;;  %s4069_s3 = inlined_call_operand.vmem [shape: bf16[5,32,32], index: 3, kind: input, shape index: {}]   ;;  %s4070_s4 = inlined_call_operand.vmem [shape: f32[32,1], index: 4, kind: input, shape index: {}]   ;;  %s4071_s5 = inlined_call_operand.vmem [shape: bf16[5,32,32], index: 5, kind: input, shape index: {}]   ;;  %s4072_s6 = inlined_call_operand.vmem [shape: f32[32,1], index: 6, kind: input, shape index: {}]   ;;  %s4073_s7 = inlined_call_operand.vmem [shape: bf16[5,32,32], index: 7, kind: input, shape index: {}]   ;;  %s4074_s8 = inlined_call_operand.vmem [shape: f32[32,1], index: 8, kind: input, shape index: {}]   ;;  %s4075_s9 = inlined_call_operand.vmem [shape: bf16[5,4,32], index: 9, kind: input, shape index: {}]   ;;  %s4076_s10 = inlined_call_operand.vmem [shape: f32[4,1], index: 10, kind: input, shape index: {}]   ;;  %s4077_s11 = inlined_call_operand.hbm [shape: f32[2,4,16], index: 11, kind: output, shape index: {}]  }
   0x1   :  { %18 = vsyncpa [#allocation5 + $0x1], 0 }
   0x2   :  { %19 = vsyncpa [#allocation6], 0 }
   0x3   :  { %21 = vsyncpa [#allocation6 + $0x1], 0  ;;  %s3450_s17 = smov 0   ;;  %s3452_s18 = smov 0  }
   0x4   :  { %s3454_s19 = smov 0   ;;  %s3456_s20 = smov 0  }
   0x5 LB: > { %4083 = sst [smem:[#allocation10_spill]] %s3375_s19  ;;  %s3471_s21 = sadd.s32 4294967295, %s3379_s20   ;;  %s3379_s20 = sphi %s3456_s20, %s4102_s20   ;;  %s3375_s19 = sphi %s3454_s19, %s4101_s19   ;;  %s3371_s18 = sphi %s3452_s18, %s4100_s18   ;;  %s3367_s17 = sphi %s3450_s17, %s4099_s17  }
   0x6   : > { %s2642_s22 = sadd.s32 4294967294, %s3379_s20   ;;  %s3475_s23 = sadd.s32 1, %s3379_s20  }
   0x7   : > { %s34_s24 = sadd.s32 1, %s3375_s19  ;;  %s31_s25 = ssub.s32 %s3379_s20, %s3475_s23 }
   0x8   : > { %p41_p0 = scmp.ne.s32.totalorder %s3375_s19, %s3371_s18  ;;  %p32_p1 = scmp.eq.s32.totalorder %s31_s25, 0 }
   0x9   : > { %p42_p2 = scmp.eq.s32.totalorder %s3379_s20, 0  ;;  %p47_p3 = scmp.ne.s32.totalorder %s3371_s18, %s3367_s17 }
   0xa   : > { %p48_p4 = scmp.eq.s32.totalorder %s3471_s21, 0  ;;  %p281_p7 = scmp.eq.s32.totalorder %s3471_s21, 1 }
   0xb   : > { %s3487_s26 = scalar_select %p32_p1, %s3375_s19, %s34_s24  }
   0xc   : > { %p3489_p5 = por %p42_p2, %p41_p0  ;;  %p3493_p6 = por %p48_p4, %p47_p3 }
   0xd   : > { %4084 = sst [smem:[#allocation11_spill]] %s3487_s26  ;;  %p287_p8 = scmp.eq.s32.totalorder %s2642_s22, 1 }
   0xe   : > { %p3168_p10 = scmp.lt.s32.totalorder %s3379_s20, 2  ;;  %p3500_p11 = por %p281_p7, %p41_p0 }
   0xf   : > { %p3504_p12 = por %p287_p8, %p47_p3  ;;  %s337_s12 = sand.u32 1, %s3375_s19  }
  0x10   : > { %s4087_s29 = scalar_select %p3500_p11, 1, 0 }
  0x11   : > { %s4088_s30 = scalar_select %p3504_p12, 1, 0 }
  0x12   : > { %s2646_s13 = sshll.u32 %s3379_s20, 6  ;;  %s2645_s14 = sshll.u32 %s337_s12, 2 }
  0x13   : > { %s3513_s24 = scalar_lea.hbm %s4066_s0, %s2646_s13  ;;  %s341_s22 = scalar_lea.vmem [#allocation4], %s2645_s14 }
  0x14   : > { %s348_s25 = sshll.u32 %s341_s22, 4  ;;  %p3517_p13 = pnand %p3168_p10, %p3489_p5  ;;  %s3521_s25 = int_to_ptr.vmem [resolvable:$true] %s348_s25 }
  0x15   : > { %s338_s15 = scalar_lea.sflag [#allocation5], %s337_s12  ;;  %s3283_s13 = scalar_lea.hbm %s3513_s24, 64 }
  0x16   : > { %p3284_p2 = scmp.ne.s32.totalorder %s3513_s24, %s3283_s13  ;;  %p3285_p3 = pneg %p3517_p13 }
  0x17   : > { %s3288_s16 = scalar_lea.hbm %s4066_s0, 128  ;;  %p3289_p5 = scmp.lt.u32.totalorder %s3513_s24, %s4066_s0 }
  0x18   : > { %p3286_p4 = pnand %p3285_p3, %p3284_p2  ;;  %p3290_p8 = scmp.lt.u32.totalorder %s3288_s16, %s3283_s13 }
  0x19   : > { %p3292_p9 = scmp.lt.u32.totalorder %s3283_s13, %s3513_s24 }
  0x1a   : > { %p3287_p7 = pneg %p3286_p4  ;;  %p3291_p10 = por %p3290_p8, %p3289_p5 }
  0x1c   : > { %p3293_p0 = por %p3292_p9, %p3291_p10 }
  0x1e   : > { %p3294_p1 = pnand %p3293_p0, %p3287_p7 }
  0x20   : > { %3297 = shalt.err (!%p3294_p1)
}
  0x21   : > { %s3298_s12 = scalar_lea.vmem %s3521_s25, 64  ;;  %s3381_s27 = smov [#allocation4]  }
  0x22   : > { %p3299_p2 = scmp.ne.s32.totalorder %s3521_s25, %s3298_s12  ;;  %s3303_s14 = sshll.u32 %s3381_s27, 4  ;;  %s3304_s14 = int_to_ptr.vmem [resolvable:$false] %s3303_s14 }
  0x23   : > { %s3305_s19 = scalar_lea.vmem %s3304_s14, 128  ;;  %p3306_p11 = scmp.lt.s32.totalorder %s3521_s25, %s3304_s14 }
  0x24   : > { %p3301_p4 = pnand %p3299_p2, %p3285_p3  ;;  %p3307_p5 = scmp.lt.s32.totalorder %s3305_s19, %s3298_s12 }
  0x26   : > { %p3302_p12 = pneg %p3301_p4  ;;  %p3308_p8 = por %p3307_p5, %p3306_p11 }
  0x28   : > { %p3309_p9 = pnand %p3308_p8, %p3302_p12 }
  0x2a   : > { %3312 = shalt.err (!%p3309_p9)
}
  0x2b   : > { %3163 = dma.hbm_to_vmem [thread:$0]  (!%p3517_p13), %s3513_s24, 64, %s3521_s25, %s338_s15  }
  0x2c   : > { %p4090_p0 = scmp.lt.s32.totalorder %s3379_s20, 3  ;;  %p4091_p1 = scmp.ge.s32.totalorder %s3379_s20, 1 }
  0x2e   : > { %p354_p3 = pnand %p4091_p1, %p4090_p0 }
  0x2f   : > { %s3555_s13 = sand.u32 (!%p354_p3), 1, %s3371_s18  }
  0x30   : > { %357 = sbr.rel (%p354_p3) target bundleno = 2087 (0x827), region = 64  ;;  %s4080_s16 = sshll.u32 (!%p354_p3), %s3555_s13, 2 }
  0x31   : > { %s360_s22 = scalar_lea.sflag (!%p354_p3), [#allocation5], %s3555_s13  ;;  %s363_s26 = scalar_lea.vmem (!%p354_p3), [#allocation4], %s4080_s16 }
  0x37   : > { %3358 = dma.done.wait (%p3493_p6), %s360_s22, 64  }
  0x38   : > { %3360 = vsyncadd (%p3493_p6), %s360_s22, 4294967232  ;;  %vm403_vm0 = vcmask 1048560   ;;  %v3382_v0 = vmov 0   ;;  %vm417_vm1 = vcmask 146560   ;;  %vm408_vm2 = vcmask 15360   ;;  %v3211_v4 = vld [vmem:[%s4067_s1 + $0x10] sm:$0xff]  }
  0x39   : > { %404 = vst.msk [vmem:[#allocation2] sm:$0xff] %vm403_vm0, %v3382_v0  ;;  %405 = vst.msk [vmem:[#allocation2 + $0x18] sm:$0xff] %vm403_vm0, %v3382_v0  ;;  %3210 = vset.pattern.permute.xlu1 %v3382_v0  ;;  %3209 = vset.pattern.permute.xlu0 %v3382_v0  ;;  %vm415_vm3 = vcmask 123904   ;;  %v413_v1 = vld [vmem:[%s363_s26] sm:$0xf]  ;;  %s3383_s25 = smov 2  }
  0x3a   : > { %406 = vst.msk [vmem:[#allocation3] sm:$0xff] %vm403_vm0, %v3382_v0  ;;  %407 = vst.msk [vmem:[#allocation3 + $0x18] sm:$0xff] %vm403_vm0, %v3382_v0  ;;  %v414_v3 = vpack.c.bf16 %v413_v1, %v413_v1  ;;  %s3384_s15 = smov 1   ;;  %vm449_vm4 = vcmask 31744   ;;  %s4081_s12 = smov 127   ;;  %v831_v8 = vld [vmem:[%s4068_s2 + $0x8] sm:$0xff] }
  0x3b   : > { %419 = vst.msk [vmem:[#allocation2 + $0x20] sm:$0xff] %vm417_vm1, %v3382_v0  ;;  %2899 = vmatprep.mubr.msk.bf16.mxu0 %vm449_vm4, %v3211_v4  ;;  %s3386_s27 = smov 126   ;;  %v830_v9 = vld [vmem:[%s4068_s2] sm:$0xff]  ;;  %v832_v10 = vld [vmem:[%s4068_s2 + $0x10] sm:$0xff]  ;;  %v833_v11 = vld [vmem:[%s4068_s2 + $0x18] sm:$0xff]  ;;  %vm447_vm5 = vcmask 7168  }
  0x3c   : > { %409 = vst.msk [vmem:[#allocation2 + $0x10] sm:$0xff] %vm408_vm2, %v3382_v0  ;;  %410 = vst.msk [vmem:[#allocation2 + $0x28] sm:$0xff] %vm408_vm2, %v3382_v0  ;;  %vm456_vm6 = vcmask 1041408   ;;  %v3212_v19 = vld [vmem:[%s4067_s1 + $0x18] sm:$0xff]   ;;  %v3213_v20 = vld [vmem:[%s4067_s1] sm:$0xff]   ;;  %vm683_vm7 = vcmask 1039360  }
  0x3d   : > { %411 = vst.msk [vmem:[#allocation3 + $0x10] sm:$0xff] %vm408_vm2, %v3382_v0  ;;  %412 = vst.msk [vmem:[#allocation3 + $0x28] sm:$0xff] %vm408_vm2, %v3382_v0  ;;  %v3214_v22 = vld [vmem:[%s4067_s1 + $0x8] sm:$0xff]   ;;  %v3215_v25 = vld [vmem:[%s4067_s1 + $0x20] sm:$0xff]   ;;  %vm766_vm8 = vcmask 1031168   ;;  %vm907_vm9 = vcmask 261120  }
  0x3e   : > { %416 = vst.msk [vmem:[#allocation2 + $0x8] sm:$0x3] %vm415_vm3, %v414_v3  ;;  %v3216_v28 = vld [vmem:[%s4067_s1 + $0x28] sm:$0xff]   ;;  %v3217_v31 = vld [vmem:[%s4067_s1 + $0x30] sm:$0xff]   ;;  %v3218_v34 = vld [vmem:[%s4067_s1 + $0x38] sm:$0xff]   ;;  %s4092_s22 = smov 127  }
  0x3f   : > { %418 = vst.msk [vmem:[#allocation2 + $0x8] sm:$0xff] %vm417_vm1, %v3382_v0  ;;  %v3219_v35 = vld [vmem:[%s4067_s1 + $0x40] sm:$0xff]   ;;  %v3220_v37 = vld [vmem:[%s4067_s1 + $0x48] sm:$0xff]   ;;  %v3221_v58 = vld [vmem:[%s4069_s3 + $0x10] sm:$0xff]   ;;  %vm3388_vm10 = vmmov 0   ;;  %vm2556_vm11 = vcmask 125952  }
  0x40   : > { %v420_v2 = vld [vmem:[#allocation2] sm:$0x3]  ;;  %2931 = vmatprep.mubr.msk.bf16.mxu1 %vm907_vm9, %v3221_v58  ;;  %v1296_v63 = vld [vmem:[%s4070_s4 + $0x10] sm:$0xff]  ;;  %v1297_v3 = vld [vmem:[%s4070_s4 + $0x18] sm:$0xff]  ;;  %p4094_p11 = scmp.ne.s32.totalorder %s4087_s29, 0  ;;  %s3389_s14 = smov [#allocation7]  }
  0x41   : > { %519 = vrot.lane.b32.xlu1 %v420_v2, %s3383_s25  ;;  %443 = vrot.lane.b32.xlu0 %v420_v2, %s3384_s15  ;;  %v3657_v38 = vld [vmem:[#allocation3] sm:$0xff]  ;;  %v3661_v39 = vld [vmem:[#allocation3 + $0x18] sm:$0xff]  ;;  %v1294_v61 = vld [vmem:[%s4070_s4] sm:$0xff]  ;;  %s3317_s19 = sshll.u32 %s3389_s14, 4  ;;  %s3318_s19 = int_to_ptr.vmem [resolvable:$false] %s3317_s19 }
  0x42   : > { %v1295_v2 = vld [vmem:[%s4070_s4 + $0x8] sm:$0xff]  ;;  %s3319_s16 = scalar_lea.vmem %s3318_s19, 128 }
  0x43   : > { %v661_v6 = vld [vmem:[#allocation2 + $0x10] sm:$0x3] }
  0x44   : > { %v3688_v62 = vld [vmem:[#allocation3 + $0x10] sm:$0xff]  ;;  %v3695_v1 = vld [vmem:[#allocation3 + $0x28] sm:$0xff] }
  0x46   : > { %v421_v5 = vld [vmem:[#allocation2 + $0x8] sm:$0x3] }
  0x47   : > { %521 = vrot.lane.b32.xlu1 %v421_v5, %s3383_s25  ;;  %445 = vrot.lane.b32.xlu0 %v421_v5, %s3384_s15  ;;  %v660_v7 = vld [vmem:[#allocation2 + $0x8] sm:$0x3]  ;;  %v605_v26 = vsel %vm456_vm6, %v421_v5, 0 }
  0x4b   : > { %681 = vrot.lane.b32.xlu1 %v661_v6, %s4081_s12  ;;  %679 = vrot.lane.b32.xlu0 %v660_v7, %s4081_s12  ;;  %s2804_s12 = sshll.u32 %s3471_s21, 6  ;;  %s2559_s21 = scalar_lea.sflag [#allocation6], %s3555_s13 }
  0x4c   : > { %s4022_s28 = scalar_lea.hbm %s4077_s11, %s2804_s12 }
  0x4f   : > { %764 = vrot.lane.b32.xlu1 %v661_v6, %s3386_s27  ;;  %762 = vrot.lane.b32.xlu0 %v660_v7, %s3386_s27 }
  0x53   : > { %841 = vperm.xlu1 %3210, %v831_v8   ;;  %836 = vperm.xlu0 %3209, %v830_v9  }
  0x57   : > { %846 = vperm.xlu1 %3210, %v832_v10   ;;  %851 = vperm.xlu0 %3209, %v833_v11   ;;  %v3222_v11 = vld [vmem:[%s4069_s3 + $0x18] sm:$0xff]  }
  0x5b   : > { %895 = vrot.lane.b32.xlu1 %v3657_v38, %s3384_s15 }
  0x5f   : > { %899 = vrot.lane.b32.xlu1 %v3661_v39, %s3384_s15 }
  0x63   : > { %973 = vrot.lane.b32.xlu1 %v3657_v38, %s3383_s25 }
  0x67   : > { %977 = vrot.lane.b32.xlu1 %v3661_v39, %s3383_s25 }
  0xb3   : > { %v520_v12 = vpop.permute.xlu1 %519  ;;  %v444_v13 = vpop.permute.xlu0 %443 }
  0xb9   : > { %v522_v14 = vpop.permute.xlu1 %521  ;;  %v446_v15 = vpop.permute.xlu0 %445 }
  0xba   : > { %v524_v16 = vsel %vm408_vm2, %v520_v12, %v522_v14  ;;  %v448_v17 = vsel %vm447_vm5, %v444_v13, %v446_v15  ;;  %v3223_v12 = vld [vmem:[%s4069_s3] sm:$0xff]  }
  0xbb   : > { %3151 = vmatprep.subr.msk.bf16.mxu0 %vm456_vm6, %v448_v17  ;;  %v458_v18 = vsel %vm456_vm6, %v448_v17, 0  ;;  %v532_v21 = vsel %vm456_vm6, %v524_v16, 0 }
  0xbc   : > { %2898 = vmatpush3.bf16.msra.mxu0 %v458_v18  ;;  %v3224_v18 = vld [vmem:[%s4069_s3 + $0x8] sm:$0xff]  }
  0xbd   : > { %3152 = vmatprep.subr.msk.bf16.mxu0 %vm456_vm6, %v524_v16  ;;  %v682_v23 = vpop.permute.xlu1 %681  ;;  %v680_v24 = vpop.permute.xlu0 %679 }
  0xbe   : > { %v684_v27 = vsel %vm683_vm7, %v680_v24, %v682_v23 }
  0xbf   : > { %2900 = vmatmul.mubr.msk.bf16.vlgmr.msra.gmra.mrb[0].mxu0 %vm449_vm4, %v3212_v19  ;;  %v692_v32 = vsel %vm456_vm6, %v684_v27, 0  ;;  %v3225_v19 = vld [vmem:[%s4069_s3 + $0x20] sm:$0xff]  }
  0xc0   : > { %2904 = vmatpush3.bf16.msra.mxu0 %v532_v21  ;;  %2905 = vmatprep.mubr.msk.bf16.mxu0 %vm449_vm4, %v3213_v20 }
  0xc1   : > { %3153 = vmatprep.subr.msk.bf16.mxu0 %vm456_vm6, %v421_v5  ;;  %v765_v29 = vpop.permute.xlu1 %764  ;;  %v763_v30 = vpop.permute.xlu0 %762 }
  0xc2   : > { %v767_v33 = vsel %vm766_vm8, %v763_v30, %v765_v29 }
  0xc3   : > { %v775_v36 = vsel %vm456_vm6, %v767_v33, 0 }
  0xcb   : > { %2906 = vmatmul.mubr.msk.bf16.vlgmr.msra.gmra.mrb[0].mxu0 %vm449_vm4, %v3214_v22 }
  0xcc   : > { %2910 = vmatpush3.bf16.msra.mxu0 %v605_v26  ;;  %2911 = vmatprep.mubr.msk.bf16.mxu0 %vm449_vm4, %v3215_v25  ;;  %v3226_v25 = vld [vmem:[%s4069_s3 + $0x28] sm:$0xff]   ;;  %v3227_v26 = vld [vmem:[%s4069_s3 + $0x30] sm:$0xff]  }
  0xcd   : > { %3154 = vmatprep.subr.msk.bf16.mxu0 %vm456_vm6, %v684_v27 }
  0xd2   : > { %v842_v40 = vpop.permute.xlu1 %841  ;;  %v837_v41 = vpop.permute.xlu0 %836 }
  0xd6   : > { %v847_v42 = vpop.permute.xlu1 %846  ;;  %v852_v44 = vpop.permute.xlu0 %851 }
  0xd7   : > { %2912 = vmatmul.mubr.msk.bf16.vlgmr.msra.gmra.mrb[0].mxu0 %vm449_vm4, %v3216_v28 }
  0xd8   : > { %2916 = vmatpush3.bf16.msra.mxu0 %v692_v32  ;;  %2917 = vmatprep.mubr.msk.bf16.mxu0 %vm449_vm4, %v3217_v31  ;;  %v3228_v31 = vld [vmem:[%s4069_s3 + $0x38] sm:$0xff]   ;;  %v3229_v32 = vld [vmem:[%s4069_s3 + $0x40] sm:$0xff]  }
  0xd9   : > { %3155 = vmatprep.subr.msk.bf16.mxu0 %vm456_vm6, %v767_v33 }
  0xda   : > { %v896_v4 = vpop.permute.xlu1 %895 }
  0xde   : > { %v900_v6 = vpop.permute.xlu1 %899 }
  0xe2   : > { %v974_v10 = vpop.permute.xlu1 %973 }
  0xe3   : > { %2918 = vmatmul.mubr.msk.bf16.vlgmr.msra.gmra.mrb[0].mxu0 %vm449_vm4, %v3218_v34 }
  0xe4   : > { %2922 = vmatpush3.bf16.msra.mxu0 %v775_v36  ;;  %2923 = vmatprep.mubr.msk.bf16.mxu0 %vm449_vm4, %v3219_v35  ;;  %v3230_v36 = vld [vmem:[%s4069_s3 + $0x48] sm:$0xff]  }
  0xe6   : > { %v978_v15 = vpop.permute.xlu1 %977 }
  0xef   : > { %2924 = vmatmul.mubr.msk.bf16.vlgmr.msra.gmra.mrb[0].mxu0 %vm449_vm4, %v3220_v37  ;;  %v3753_v37 = vld [vmem:[#allocation2] sm:$0xff] }
 0x1c2   : > { %v2925_v43 = vpop.f32.mrb[0].mxu0 }
 0x1c3   : > { %v856_v45 = vadd.f32 %v2925_v43, %v847_v42  ;;  %v811_v46 = vpop.f32.mrb[1].mxu0 }
 0x1c4   : > { %v854_v47 = vadd.f32 %v837_v41, %v811_v46  ;;  %v2926_v48 = vpop.f32.mrb[2].mxu0 }
 0x1c5   : > { %3251 = vtanh.f32 %v856_v45  ;;  %v857_v49 = vadd.f32 %v2926_v48, %v852_v44  ;;  %v814_v50 = vpop.f32.mrb[3].mxu0 }
 0x1c6   : > { %3253 = vtanh.f32 %v854_v47  ;;  %v855_v51 = vadd.f32 %v842_v40, %v814_v50  ;;  %v3757_v40 = vld [vmem:[#allocation2 + $0x18] sm:$0xff] }
 0x1c7   : > { %3255 = vtanh.f32 %v857_v49 }
 0x1c8   : > { %3257 = vtanh.f32 %v855_v51 }
 0x1cf   : > { %v3252_v52 = vpop.eup %3251 }
 0x1d0   : > { %v3254_v53 = vpop.eup %3253 }
 0x1d1   : > { %v3256_v54 = vpop.eup %3255 }
 0x1d2   : > { %v3258_v55 = vpop.eup %3257  ;;  %v863_v56 = vpack.c.bf16 %v3256_v54, %v3252_v52 }
 0x1d3   : > { %v862_v57 = vpack.c.bf16 %v3258_v55, %v3254_v53 }
 0x1d4   : > { %865 = vst [vmem:[#allocation3 + $0x20] sm:$0xff] %v863_v56 }
 0x1d5   : > { %867 = vst.msk [vmem:[#allocation3 + $0x20] sm:$0xff] %vm417_vm1, %v3382_v0  ;;  %864 = vst [vmem:[#allocation3 + $0x8] sm:$0xff] %v862_v57 }
 0x1d6   : > { %866 = vst.msk [vmem:[#allocation3 + $0x8] sm:$0xff] %vm417_vm1, %v3382_v0 }
 0x1dc   : > { %v1116_v60 = vld [vmem:[#allocation3 + $0x20] sm:$0xff] }
 0x1dd   : > { %v1114_v59 = vld [vmem:[#allocation3 + $0x8] sm:$0xff] }
 0x1de   : > { %1137 = vrot.lane.b32.xlu1 %v1114_v59, %s4092_s22  ;;  %897 = vrot.lane.b32.xlu0 %v1114_v59, %s3384_s15 }
 0x1e2   : > { %1141 = vrot.lane.b32.xlu1 %v1116_v60, %s4092_s22  ;;  %901 = vrot.lane.b32.xlu0 %v1116_v60, %s3384_s15 }
 0x1e6   : > { %1223 = vrot.lane.b32.xlu1 %v1114_v59, %s3386_s27  ;;  %975 = vrot.lane.b32.xlu0 %v1114_v59, %s3383_s25 }
 0x1ea   : > { %1227 = vrot.lane.b32.xlu1 %v1116_v60, %s3386_s27  ;;  %979 = vrot.lane.b32.xlu0 %v1116_v60, %s3383_s25 }
 0x1ee   : > { %1300 = vperm.xlu1 %3210, %v1294_v61   ;;  %1139 = vrot.lane.b32.xlu0 %v3688_v62, %s4092_s22 }
 0x1f2   : > { %1310 = vperm.xlu1 %3210, %v1296_v63   ;;  %1143 = vrot.lane.b32.xlu0 %v3695_v1, %s4092_s22  ;;  %v1757_v63 = vld [vmem:[%s4072_s6] sm:$0xff] }
 0x1f6   : > { %1225 = vrot.lane.b32.xlu0 %v3688_v62, %s3386_s27  ;;  %1359 = vrot.lane.b32.xlu1 %v3753_v37, %s3384_s15 }
 0x1fa   : > { %1229 = vrot.lane.b32.xlu0 %v3695_v1, %s3386_s27  ;;  %1363 = vrot.lane.b32.xlu1 %v3757_v40, %s3384_s15 }
 0x1fe   : > { %1305 = vperm.xlu0 %3209, %v1295_v2   ;;  %1436 = vrot.lane.b32.xlu1 %v3753_v37, %s3383_s25  ;;  %v3784_v2 = vld [vmem:[#allocation2 + $0x10] sm:$0xff] }
 0x202   : > { %1315 = vperm.xlu0 %3209, %v1297_v3   ;;  %1440 = vrot.lane.b32.xlu1 %v3757_v40, %s3383_s25  ;;  %v1759_v3 = vld [vmem:[%s4072_s6 + $0x10] sm:$0xff] }
 0x250   : > { %v898_v5 = vpop.permute.xlu0 %897  ;;  %v1138_v20 = vpop.permute.xlu1 %1137 }
 0x251   : > { %v903_v7 = vsel %vm447_vm5, %v896_v4, %v898_v5  ;;  %v3791_v4 = vld [vmem:[#allocation2 + $0x28] sm:$0xff] }
 0x252   : > { %2927 = vmatprep.subr.bf16.mxu1 %v903_v7  ;;  %v1758_v5 = vld [vmem:[%s4072_s6 + $0x8] sm:$0xff] }
 0x253   : > { %2928 = vmatpush3.bf16.msra.mxu1 %v903_v7 }
 0x254   : > { %v902_v8 = vpop.permute.xlu0 %901  ;;  %v1142_v23 = vpop.permute.xlu1 %1141 }
 0x255   : > { %v904_v9 = vsel %vm447_vm5, %v900_v6, %v902_v8  ;;  %v1760_v6 = vld [vmem:[%s4072_s6 + $0x18] sm:$0xff] }
 0x256   : > { %2929 = vmatprep.subr.bf16.mxu1 %v904_v9 }
 0x257   : > { %2930 = vmatpush3.bf16.msra.mxu1 %v904_v9 }
 0x258   : > { %v976_v13 = vpop.permute.xlu0 %975  ;;  %v1224_v28 = vpop.permute.xlu1 %1223 }
 0x259   : > { %v981_v14 = vsel %vm408_vm2, %v974_v10, %v976_v13 }
 0x25a   : > { %2932 = vmatmul.mubr.msk.bf16.vlgmr.msra.gmra.mrb[0].mxu1 %vm907_vm9, %v3222_v11  ;;  %2935 = vmatprep.subr.bf16.mxu1 %v981_v14 }
 0x25b   : > { %2936 = vmatpush3.bf16.msra.mxu1 %v981_v14  ;;  %2939 = vmatprep.mubr.msk.bf16.mxu1 %vm907_vm9, %v3223_v12 }
 0x25c   : > { %v980_v16 = vpop.permute.xlu0 %979  ;;  %v1228_v33 = vpop.permute.xlu1 %1227 }
 0x25d   : > { %v982_v17 = vsel %vm408_vm2, %v978_v15, %v980_v16 }
 0x25e   : > { %2937 = vmatprep.subr.bf16.mxu1 %v982_v17 }
 0x25f   : > { %2938 = vmatpush3.bf16.msra.mxu1 %v982_v17 }
 0x260   : > { %2943 = vmatprep.subr.bf16.mxu1 %v1114_v59  ;;  %v1140_v21 = vpop.permute.xlu0 %1139 }
 0x261   : > { %v1145_v22 = vsel %vm683_vm7, %v1138_v20, %v1140_v21  ;;  %v3235_v20 = vld [vmem:[%s4071_s5 + $0x20] sm:$0xff]  }
 0x264   : > { %v1144_v24 = vpop.permute.xlu0 %1143 }
 0x265   : > { %v1146_v27 = vsel %vm683_vm7, %v1142_v23, %v1144_v24 }
 0x266   : > { %2940 = vmatmul.mubr.msk.bf16.vlgmr.msra.gmra.mrb[0].mxu1 %vm907_vm9, %v3224_v18 }
 0x267   : > { %2944 = vmatpush3.bf16.msra.mxu1 %v1114_v59  ;;  %2947 = vmatprep.mubr.msk.bf16.mxu1 %vm907_vm9, %v3225_v19  ;;  %v3231_v59 = vld [vmem:[%s4071_s5 + $0x10] sm:$0xff]   ;;  %v3234_v19 = vld [vmem:[%s4071_s5 + $0x8] sm:$0xff]  }
 0x268   : > { %2945 = vmatprep.subr.bf16.mxu1 %v1116_v60  ;;  %v1226_v29 = vpop.permute.xlu0 %1225  ;;  %2971 = vmatprep.mubr.msk.bf16.mxu0 %vm907_vm9, %v3231_v59 }
 0x269   : > { %v1231_v30 = vsel %vm766_vm8, %v1224_v28, %v1226_v29 }
 0x26b   : > { %2946 = vmatpush3.bf16.msra.mxu1 %v1116_v60 }
 0x26c   : > { %2951 = vmatprep.subr.bf16.mxu1 %v1145_v22  ;;  %v1230_v34 = vpop.permute.xlu0 %1229 }
 0x26d   : > { %v1232_v35 = vsel %vm766_vm8, %v1228_v33, %v1230_v34  ;;  %v1301_v41 = vpop.permute.xlu1 %1300  ;;  %v3239_v33 = vld [vmem:[%s4071_s5 + $0x40] sm:$0xff]  }
 0x271   : > { %v1311_v43 = vpop.permute.xlu1 %1310 }
 0x272   : > { %2948 = vmatmul.mubr.msk.bf16.vlgmr.msra.gmra.mrb[0].mxu1 %vm907_vm9, %v3226_v25 }
 0x273   : > { %2952 = vmatpush3.bf16.msra.mxu1 %v1145_v22  ;;  %2955 = vmatprep.mubr.msk.bf16.mxu1 %vm907_vm9, %v3227_v26  ;;  %v3236_v26 = vld [vmem:[%s4071_s5 + $0x28] sm:$0xff]  }
 0x274   : > { %2953 = vmatprep.subr.bf16.mxu1 %v1146_v27 }
 0x275   : > { %v1360_v7 = vpop.permute.xlu1 %1359 }
 0x277   : > { %2954 = vmatpush3.bf16.msra.mxu1 %v1146_v27  ;;  %v3237_v27 = vld [vmem:[%s4071_s5 + $0x30] sm:$0xff]  }
 0x278   : > { %2959 = vmatprep.subr.bf16.mxu1 %v1231_v30 }
 0x279   : > { %v1364_v9 = vpop.permute.xlu1 %1363 }
 0x27d   : > { %v1306_v42 = vpop.permute.xlu0 %1305  ;;  %v1437_v13 = vpop.permute.xlu1 %1436 }
 0x27e   : > { %2956 = vmatmul.mubr.msk.bf16.vlgmr.msra.gmra.mrb[0].mxu1 %vm907_vm9, %v3228_v31 }
 0x27f   : > { %2960 = vmatpush3.bf16.msra.mxu1 %v1231_v30  ;;  %2963 = vmatprep.mubr.msk.bf16.mxu1 %vm907_vm9, %v3229_v32  ;;  %v3238_v32 = vld [vmem:[%s4071_s5 + $0x38] sm:$0xff]  }
 0x280   : > { %2961 = vmatprep.subr.bf16.mxu1 %v1232_v35 }
 0x281   : > { %v1316_v47 = vpop.permute.xlu0 %1315  ;;  %v1441_v16 = vpop.permute.xlu1 %1440 }
 0x283   : > { %2962 = vmatpush3.bf16.msra.mxu1 %v1232_v35 }
 0x28a   : > { %2964 = vmatmul.mubr.msk.bf16.vlgmr.msra.gmra.mrb[0].mxu1 %vm907_vm9, %v3230_v36 }
 0x35d   : > { %v2965_v44 = vpop.f32.mrb[0].mxu1 }
 0x35e   : > { %v1320_v45 = vadd.f32 %v2965_v44, %v1311_v43  ;;  %v1275_v46 = vpop.f32.mrb[1].mxu1 }
 0x35f   : > { %v1318_v48 = vadd.f32 %v1301_v41, %v1275_v46  ;;  %v2966_v49 = vpop.f32.mrb[2].mxu1  ;;  %v3240_v41 = vld [vmem:[%s4071_s5 + $0x48] sm:$0xff]  }
 0x360   : > { %3259 = vtanh.f32 %v1320_v45  ;;  %v1321_v50 = vadd.f32 %v2966_v49, %v1316_v47  ;;  %v1278_v51 = vpop.f32.mrb[3].mxu1 }
 0x361   : > { %3261 = vtanh.f32 %v1318_v48  ;;  %v1319_v52 = vadd.f32 %v1306_v42, %v1278_v51 }
 0x362   : > { %3263 = vtanh.f32 %v1321_v50 }
 0x363   : > { %3265 = vtanh.f32 %v1319_v52 }
 0x36a   : > { %v3260_v53 = vpop.eup %3259 }
 0x36b   : > { %v3262_v54 = vpop.eup %3261 }
 0x36c   : > { %v3264_v55 = vpop.eup %3263 }
 0x36d   : > { %v3266_v56 = vpop.eup %3265  ;;  %v1327_v57 = vpack.c.bf16 %v3264_v55, %v3260_v53 }
 0x36e   : > { %v1326_v58 = vpack.c.bf16 %v3266_v56, %v3262_v54 }
 0x36f   : > { %1329 = vst [vmem:[#allocation2 + $0x20] sm:$0xff] %v1327_v57 }
 0x370   : > { %1331 = vst.msk [vmem:[#allocation2 + $0x20] sm:$0xff] %vm417_vm1, %v3382_v0  ;;  %1328 = vst [vmem:[#allocation2 + $0x8] sm:$0xff] %v1326_v58 }
 0x371   : > { %1330 = vst.msk [vmem:[#allocation2 + $0x8] sm:$0xff] %vm417_vm1, %v3382_v0 }
 0x377   : > { %v1579_v61 = vld [vmem:[#allocation2 + $0x20] sm:$0xff] }
 0x378   : > { %v1577_v60 = vld [vmem:[#allocation2 + $0x8] sm:$0xff] }
 0x379   : > { %1600 = vrot.lane.b32.xlu1 %v1577_v60, %s4092_s22  ;;  %1361 = vrot.lane.b32.xlu0 %v1577_v60, %s3384_s15 }
 0x37d   : > { %1604 = vrot.lane.b32.xlu1 %v1579_v61, %s4092_s22  ;;  %1365 = vrot.lane.b32.xlu0 %v1579_v61, %s3384_s15 }
 0x381   : > { %1686 = vrot.lane.b32.xlu1 %v1577_v60, %s3386_s27  ;;  %1438 = vrot.lane.b32.xlu0 %v1577_v60, %s3383_s25 }
 0x385   : > { %1690 = vrot.lane.b32.xlu1 %v1579_v61, %s3386_s27  ;;  %1442 = vrot.lane.b32.xlu0 %v1579_v61, %s3383_s25 }
 0x389   : > { %1763 = vperm.xlu1 %3210, %v1757_v63   ;;  %1602 = vrot.lane.b32.xlu0 %v3784_v2, %s4092_s22 }
 0x38d   : > { %1773 = vperm.xlu1 %3210, %v1759_v3   ;;  %1606 = vrot.lane.b32.xlu0 %v3791_v4, %s4092_s22  ;;  %v2220_v3 = vld [vmem:[%s4074_s8] sm:$0xff] }
 0x391   : > { %1688 = vrot.lane.b32.xlu0 %v3784_v2, %s3386_s27  ;;  %1822 = vrot.lane.b32.xlu1 %v3657_v38, %s3384_s15 }
 0x395   : > { %1692 = vrot.lane.b32.xlu0 %v3791_v4, %s3386_s27  ;;  %1826 = vrot.lane.b32.xlu1 %v3661_v39, %s3384_s15 }
 0x399   : > { %1768 = vperm.xlu0 %3209, %v1758_v5   ;;  %1899 = vrot.lane.b32.xlu1 %v3657_v38, %s3383_s25  ;;  %v3232_v38 = vld [vmem:[%s4071_s5 + $0x18] sm:$0xff]   ;;  %v2222_v5 = vld [vmem:[%s4074_s8 + $0x10] sm:$0xff] }
 0x39d   : > { %1778 = vperm.xlu0 %3209, %v1760_v6   ;;  %1903 = vrot.lane.b32.xlu1 %v3661_v39, %s3383_s25  ;;  %v3233_v39 = vld [vmem:[%s4071_s5] sm:$0xff]   ;;  %v2221_v6 = vld [vmem:[%s4074_s8 + $0x8] sm:$0xff] }
 0x3eb   : > { %v1362_v8 = vpop.permute.xlu0 %1361  ;;  %v1601_v21 = vpop.permute.xlu1 %1600 }
 0x3ec   : > { %v1367_v10 = vsel %vm447_vm5, %v1360_v7, %v1362_v8 }
 0x3ed   : > { %2967 = vmatprep.subr.bf16.mxu0 %v1367_v10 }
 0x3ee   : > { %2968 = vmatpush3.bf16.msra.mxu0 %v1367_v10 }
 0x3ef   : > { %v1366_v11 = vpop.permute.xlu0 %1365  ;;  %v1605_v24 = vpop.permute.xlu1 %1604 }
 0x3f0   : > { %v1368_v12 = vsel %vm447_vm5, %v1364_v9, %v1366_v11 }
 0x3f1   : > { %2969 = vmatprep.subr.bf16.mxu0 %v1368_v12 }
 0x3f2   : > { %2970 = vmatpush3.bf16.msra.mxu0 %v1368_v12 }
 0x3f3   : > { %v1439_v14 = vpop.permute.xlu0 %1438  ;;  %v1687_v29 = vpop.permute.xlu1 %1686 }
 0x3f4   : > { %v1444_v15 = vsel %vm408_vm2, %v1437_v13, %v1439_v14 }
 0x3f5   : > { %2972 = vmatmul.mubr.msk.bf16.vlgmr.msra.gmra.mrb[4].mxu0 %vm907_vm9, %v3232_v38  ;;  %2975 = vmatprep.subr.bf16.mxu0 %v1444_v15 }
 0x3f6   : > { %2976 = vmatpush3.bf16.msra.mxu0 %v1444_v15  ;;  %2979 = vmatprep.mubr.msk.bf16.mxu0 %vm907_vm9, %v3233_v39 }
 0x3f7   : > { %v1443_v17 = vpop.permute.xlu0 %1442  ;;  %v1691_v34 = vpop.permute.xlu1 %1690 }
 0x3f8   : > { %v1445_v18 = vsel %vm408_vm2, %v1441_v16, %v1443_v17  ;;  %v3244_v16 = vld [vmem:[%s4073_s7 + $0x8] sm:$0xff]   ;;  %v3245_v17 = vld [vmem:[%s4073_s7 + $0x20] sm:$0xff]  }
 0x3f9   : > { %2977 = vmatprep.subr.bf16.mxu0 %v1445_v18 }
 0x3fa   : > { %2978 = vmatpush3.bf16.msra.mxu0 %v1445_v18 }
 0x3fb   : > { %2983 = vmatprep.subr.bf16.mxu0 %v1577_v60  ;;  %v1603_v22 = vpop.permute.xlu0 %1602 }
 0x3fc   : > { %v1608_v23 = vsel %vm683_vm7, %v1601_v21, %v1603_v22 }
 0x3ff   : > { %v1607_v25 = vpop.permute.xlu0 %1606 }
 0x400   : > { %v1609_v28 = vsel %vm683_vm7, %v1605_v24, %v1607_v25  ;;  %v3247_v24 = vld [vmem:[%s4073_s7 + $0x30] sm:$0xff]  }
 0x401   : > { %2980 = vmatmul.mubr.msk.bf16.vlgmr.msra.gmra.mrb[4].mxu0 %vm907_vm9, %v3234_v19 }
 0x402   : > { %2984 = vmatpush3.bf16.msra.mxu0 %v1577_v60  ;;  %2987 = vmatprep.mubr.msk.bf16.mxu0 %vm907_vm9, %v3235_v20  ;;  %v3241_v60 = vld [vmem:[%s4073_s7 + $0x10] sm:$0xff]  }
 0x403   : > { %2985 = vmatprep.subr.bf16.mxu0 %v1579_v61  ;;  %v1689_v30 = vpop.permute.xlu0 %1688  ;;  %3011 = vmatprep.mubr.msk.bf16.mxu1 %vm907_vm9, %v3241_v60 }
 0x404   : > { %v1694_v31 = vsel %vm766_vm8, %v1687_v29, %v1689_v30  ;;  %v3248_v29 = vld [vmem:[%s4073_s7 + $0x38] sm:$0xff]   ;;  %v3249_v30 = vld [vmem:[%s4073_s7 + $0x40] sm:$0xff]  }
 0x406   : > { %2986 = vmatpush3.bf16.msra.mxu0 %v1579_v61 }
 0x407   : > { %2991 = vmatprep.subr.bf16.mxu0 %v1608_v23  ;;  %v1693_v35 = vpop.permute.xlu0 %1692 }
 0x408   : > { %v1695_v36 = vsel %vm766_vm8, %v1691_v34, %v1693_v35  ;;  %v1764_v42 = vpop.permute.xlu1 %1763  ;;  %v3250_v34 = vld [vmem:[%s4073_s7 + $0x48] sm:$0xff]  }
 0x40c   : > { %v1774_v44 = vpop.permute.xlu1 %1773 }
 0x40d   : > { %2988 = vmatmul.mubr.msk.bf16.vlgmr.msra.gmra.mrb[4].mxu0 %vm907_vm9, %v3236_v26 }
 0x40e   : > { %2992 = vmatpush3.bf16.msra.mxu0 %v1608_v23  ;;  %2995 = vmatprep.mubr.msk.bf16.mxu0 %vm907_vm9, %v3237_v27  ;;  %v3246_v23 = vld [vmem:[%s4073_s7 + $0x28] sm:$0xff]  }
 0x40f   : > { %2993 = vmatprep.subr.bf16.mxu0 %v1609_v28 }
 0x412   : > { %2994 = vmatpush3.bf16.msra.mxu0 %v1609_v28 }
 0x413   : > { %2999 = vmatprep.subr.bf16.mxu0 %v1694_v31 }
 0x418   : > { %v1769_v43 = vpop.permute.xlu0 %1768 }
 0x419   : > { %2996 = vmatmul.mubr.msk.bf16.vlgmr.msra.gmra.mrb[4].mxu0 %vm907_vm9, %v3238_v32 }
 0x41a   : > { %3000 = vmatpush3.bf16.msra.mxu0 %v1694_v31  ;;  %3003 = vmatprep.mubr.msk.bf16.mxu0 %vm907_vm9, %v3239_v33 }
 0x41b   : > { %3001 = vmatprep.subr.bf16.mxu0 %v1695_v36 }
 0x41c   : > { %v1779_v48 = vpop.permute.xlu0 %1778 }
 0x41e   : > { %3002 = vmatpush3.bf16.msra.mxu0 %v1695_v36 }
 0x425   : > { %3004 = vmatmul.mubr.msk.bf16.vlgmr.msra.gmra.mrb[4].mxu0 %vm907_vm9, %v3240_v41 }
 0x4f8   : > { %v3005_v45 = vpop.f32.mrb[4].mxu0 }
 0x4f9   : > { %v1783_v46 = vadd.f32 %v3005_v45, %v1774_v44  ;;  %v1738_v47 = vpop.f32.mrb[5].mxu0 }
 0x4fa   : > { %v1781_v49 = vadd.f32 %v1764_v42, %v1738_v47  ;;  %v3006_v50 = vpop.f32.mrb[6].mxu0 }
 0x4fb   : > { %3267 = vtanh.f32 %v1783_v46  ;;  %v1784_v51 = vadd.f32 %v3006_v50, %v1779_v48  ;;  %v1741_v52 = vpop.f32.mrb[7].mxu0 }
 0x4fc   : > { %3269 = vtanh.f32 %v1781_v49  ;;  %v1782_v53 = vadd.f32 %v1769_v43, %v1741_v52 }
 0x4fd   : > { %3271 = vtanh.f32 %v1784_v51 }
 0x4fe   : > { %3273 = vtanh.f32 %v1782_v53 }
 0x505   : > { %v3268_v54 = vpop.eup %3267 }
 0x506   : > { %v3270_v55 = vpop.eup %3269 }
 0x507   : > { %v3272_v56 = vpop.eup %3271 }
 0x508   : > { %v3274_v57 = vpop.eup %3273  ;;  %v1790_v58 = vpack.c.bf16 %v3272_v56, %v3268_v54 }
 0x509   : > { %v1789_v59 = vpack.c.bf16 %v3274_v57, %v3270_v55  ;;  %v3387_v57 = vmov 0.0  }
 0x50a   : > { %1792 = vst [vmem:[#allocation3 + $0x20] sm:$0xff] %v1790_v58  ;;  %3047 = vmatprep.subr.bf16.mxu0 %v3387_v57  ;;  %3051 = vmatprep.mubr.msk.bf16.mxu0 %vm3388_vm10, %v3387_v57 }
 0x50b   : > { %1794 = vst.msk [vmem:[#allocation3 + $0x20] sm:$0xff] %vm417_vm1, %v3382_v0  ;;  %1791 = vst [vmem:[#allocation3 + $0x8] sm:$0xff] %v1789_v59 }
 0x50c   : > { %1793 = vst.msk [vmem:[#allocation3 + $0x8] sm:$0xff] %vm417_vm1, %v3382_v0 }
 0x512   : > { %v2042_v63 = vld [vmem:[#allocation3 + $0x20] sm:$0xff] }
 0x513   : > { %v2040_v61 = vld [vmem:[#allocation3 + $0x8] sm:$0xff] }
 0x514   : > { %2063 = vrot.lane.b32.xlu1 %v2040_v61, %s4092_s22  ;;  %1824 = vrot.lane.b32.xlu0 %v2040_v61, %s3384_s15 }
 0x518   : > { %2067 = vrot.lane.b32.xlu1 %v2042_v63, %s4092_s22  ;;  %1828 = vrot.lane.b32.xlu0 %v2042_v63, %s3384_s15 }
 0x51c   : > { %2149 = vrot.lane.b32.xlu1 %v2040_v61, %s3386_s27  ;;  %1901 = vrot.lane.b32.xlu0 %v2040_v61, %s3383_s25 }
 0x520   : > { %2153 = vrot.lane.b32.xlu1 %v2042_v63, %s3386_s27  ;;  %1905 = vrot.lane.b32.xlu0 %v2042_v63, %s3383_s25 }
 0x524   : > { %2226 = vperm.xlu1 %3210, %v2220_v3   ;;  %2065 = vrot.lane.b32.xlu0 %v3688_v62, %s4092_s22 }
 0x528   : > { %2236 = vperm.xlu1 %3210, %v2222_v5   ;;  %2069 = vrot.lane.b32.xlu0 %v3695_v1, %s4092_s22 }
 0x52c   : > { %2151 = vrot.lane.b32.xlu0 %v3688_v62, %s3386_s27  ;;  %2269 = vrot.lane.b32.xlu1 %v3753_v37, %s3384_s15  ;;  %v2223_v62 = vld [vmem:[%s4074_s8 + $0x18] sm:$0xff] }
 0x530   : > { %2155 = vrot.lane.b32.xlu0 %v3695_v1, %s3386_s27  ;;  %2273 = vrot.lane.b32.xlu1 %v3757_v40, %s3384_s15  ;;  %v1823_v1 = vpop.permute.xlu1 %1822 }
 0x534   : > { %2231 = vperm.xlu0 %3209, %v2221_v6   ;;  %2324 = vrot.lane.b32.xlu1 %v3753_v37, %s3383_s25  ;;  %v1827_v8 = vpop.permute.xlu1 %1826  ;;  %v3242_v37 = vld [vmem:[%s4073_s7 + $0x18] sm:$0xff]  }
 0x538   : > { %2241 = vperm.xlu0 %3209, %v2223_v62   ;;  %2328 = vrot.lane.b32.xlu1 %v3757_v40, %s3383_s25  ;;  %v1900_v12 = vpop.permute.xlu1 %1899  ;;  %v3243_v40 = vld [vmem:[%s4073_s7] sm:$0xff]  }
 0x53c   : > { %v1904_v39 = vpop.permute.xlu1 %1903 }
 0x586   : > { %v1825_v7 = vpop.permute.xlu0 %1824  ;;  %v2064_v18 = vpop.permute.xlu1 %2063 }
 0x587   : > { %v1830_v9 = vsel %vm447_vm5, %v1823_v1, %v1825_v7 }
 0x588   : > { %3007 = vmatprep.subr.bf16.mxu1 %v1830_v9 }
 0x589   : > { %3008 = vmatpush3.bf16.msra.mxu1 %v1830_v9 }
 0x58a   : > { %v1829_v10 = vpop.permute.xlu0 %1828  ;;  %v2068_v21 = vpop.permute.xlu1 %2067 }
 0x58b   : > { %v1831_v11 = vsel %vm447_vm5, %v1827_v8, %v1829_v10 }
 0x58c   : > { %3009 = vmatprep.subr.bf16.mxu1 %v1831_v11 }
 0x58d   : > { %3010 = vmatpush3.bf16.msra.mxu1 %v1831_v11 }
 0x58e   : > { %v1902_v13 = vpop.permute.xlu0 %1901  ;;  %v2150_v26 = vpop.permute.xlu1 %2149 }
 0x58f   : > { %v1907_v38 = vsel %vm408_vm2, %v1900_v12, %v1902_v13 }
 0x590   : > { %3012 = vmatmul.mubr.msk.bf16.vlgmr.msra.gmra.mrb[4].mxu1 %vm907_vm9, %v3242_v37  ;;  %3015 = vmatprep.subr.bf16.mxu1 %v1907_v38  ;;  %v2262_v37 = vld [vmem:[%s4075_s9] sm:$0x3] }
 0x591   : > { %3016 = vmatpush3.bf16.msra.mxu1 %v1907_v38  ;;  %3019 = vmatprep.mubr.msk.bf16.mxu1 %vm907_vm9, %v3243_v40 }
 0x592   : > { %v1906_v14 = vpop.permute.xlu0 %1905  ;;  %v2154_v31 = vpop.permute.xlu1 %2153 }
 0x593   : > { %v1908_v15 = vsel %vm408_vm2, %v1904_v39, %v1906_v14  ;;  %v2797_v39 = vld [vmem:[%s4075_s9 + $0x4] sm:$0x3] }
 0x594   : > { %3017 = vmatprep.subr.bf16.mxu1 %v1908_v15 }
 0x595   : > { %3018 = vmatpush3.bf16.msra.mxu1 %v1908_v15 }
 0x596   : > { %3023 = vmatprep.subr.bf16.mxu1 %v2040_v61  ;;  %v2066_v19 = vpop.permute.xlu0 %2065 }
 0x597   : > { %v2071_v20 = vsel %vm683_vm7, %v2064_v18, %v2066_v19 }
 0x59a   : > { %v2070_v22 = vpop.permute.xlu0 %2069 }
 0x59b   : > { %v2072_v25 = vsel %vm683_vm7, %v2068_v21, %v2070_v22  ;;  %v2801_v21 = vld [vmem:[%s4075_s9 + $0x8] sm:$0x3] }
 0x59c   : > { %3020 = vmatmul.mubr.msk.bf16.vlgmr.msra.gmra.mrb[4].mxu1 %vm907_vm9, %v3244_v16 }
 0x59d   : > { %3024 = vmatpush3.bf16.msra.mxu1 %v2040_v61  ;;  %3027 = vmatprep.mubr.msk.bf16.mxu1 %vm907_vm9, %v3245_v17  ;;  %v2799_v17 = vld [vmem:[%s4075_s9 + $0x6] sm:$0x3] }
 0x59e   : > { %3025 = vmatprep.subr.bf16.mxu1 %v2042_v63  ;;  %v2152_v27 = vpop.permute.xlu0 %2151 }
 0x59f   : > { %v2157_v28 = vsel %vm766_vm8, %v2150_v26, %v2152_v27 }
 0x5a1   : > { %3026 = vmatpush3.bf16.msra.mxu1 %v2042_v63 }
 0x5a2   : > { %3031 = vmatprep.subr.bf16.mxu1 %v2071_v20  ;;  %v2156_v32 = vpop.permute.xlu0 %2155 }
 0x5a3   : > { %v2158_v33 = vsel %vm766_vm8, %v2154_v31, %v2156_v32  ;;  %v2227_v35 = vpop.permute.xlu1 %2226 }
 0x5a7   : > { %v2237_v41 = vpop.permute.xlu1 %2236 }
 0x5a8   : > { %3028 = vmatmul.mubr.msk.bf16.vlgmr.msra.gmra.mrb[4].mxu1 %vm907_vm9, %v3246_v23 }
 0x5a9   : > { %3032 = vmatpush3.bf16.msra.mxu1 %v2071_v20  ;;  %3035 = vmatprep.mubr.msk.bf16.mxu1 %vm907_vm9, %v3247_v24 }
 0x5aa   : > { %3033 = vmatprep.subr.bf16.mxu1 %v2072_v25 }
 0x5ab   : > { %v2270_v60 = vpop.permute.xlu1 %2269 }
 0x5ad   : > { %3034 = vmatpush3.bf16.msra.mxu1 %v2072_v25 }
 0x5ae   : > { %3039 = vmatprep.subr.bf16.mxu1 %v2157_v28 }
 0x5af   : > { %v2274_v61 = vpop.permute.xlu1 %2273 }
 0x5b3   : > { %v2232_v36 = vpop.permute.xlu0 %2231  ;;  %v2325_v63 = vpop.permute.xlu1 %2324 }
 0x5b4   : > { %3036 = vmatmul.mubr.msk.bf16.vlgmr.msra.gmra.mrb[4].mxu1 %vm907_vm9, %v3248_v29 }
 0x5b5   : > { %3040 = vmatpush3.bf16.msra.mxu1 %v2157_v28  ;;  %3043 = vmatprep.mubr.msk.bf16.mxu1 %vm907_vm9, %v3249_v30 }
 0x5b6   : > { %3041 = vmatprep.subr.bf16.mxu1 %v2158_v33 }
 0x5b7   : > { %v2242_v45 = vpop.permute.xlu0 %2241  ;;  %v2329_v6 = vpop.permute.xlu1 %2328 }
 0x5b9   : > { %3042 = vmatpush3.bf16.msra.mxu1 %v2158_v33 }
 0x5ba   : > { %3055 = vmatprep.subr.bf16.mxu1 %v3387_v57 }
 0x5c0   : > { %3044 = vmatmul.mubr.msk.bf16.vlgmr.msra.gmra.mrb[4].mxu1 %vm907_vm9, %v3250_v34 }
 0x5c1   : > { %3059 = vmatprep.mubr.msk.bf16.mxu1 %vm3388_vm10, %v3387_v57 }
 0x693   : > { %v3045_v42 = vpop.f32.mrb[4].mxu1 }
 0x694   : > { %v2246_v43 = vadd.f32 %v3045_v42, %v2237_v41  ;;  %v2201_v44 = vpop.f32.mrb[5].mxu1 }
 0x695   : > { %v2244_v46 = vadd.f32 %v2227_v35, %v2201_v44  ;;  %v3046_v47 = vpop.f32.mrb[6].mxu1 }
 0x696   : > { %3275 = vtanh.f32 %v2246_v43  ;;  %v2247_v48 = vadd.f32 %v3046_v47, %v2242_v45  ;;  %v2204_v49 = vpop.f32.mrb[7].mxu1 }
 0x697   : > { %3277 = vtanh.f32 %v2244_v46  ;;  %v2245_v50 = vadd.f32 %v2232_v36, %v2204_v49 }
 0x698   : > { %3279 = vtanh.f32 %v2247_v48 }
 0x699   : > { %3281 = vtanh.f32 %v2245_v50 }
 0x6a0   : > { %v3276_v51 = vpop.eup %3275 }
 0x6a1   : > { %v3278_v52 = vpop.eup %3277 }
 0x6a2   : > { %v3280_v53 = vpop.eup %3279 }
 0x6a3   : > { %v3282_v54 = vpop.eup %3281  ;;  %v2253_v55 = vpack.c.bf16 %v3280_v53, %v3276_v51 }
 0x6a4   : > { %v2252_v56 = vpack.c.bf16 %v3282_v54, %v3278_v52 }
 0x6a5   : > { %2255 = vst [vmem:[#allocation2 + $0x20] sm:$0xff] %v2253_v55 }
 0x6a6   : > { %2257 = vst.msk [vmem:[#allocation2 + $0x20] sm:$0xff] %vm417_vm1, %v3382_v0  ;;  %2254 = vst [vmem:[#allocation2 + $0x8] sm:$0xff] %v2252_v56 }
 0x6a7   : > { %2256 = vst.msk [vmem:[#allocation2 + $0x8] sm:$0xff] %vm417_vm1, %v3382_v0  ;;  %v2549_v0 = vld [vmem:[%s4076_s10] sm:$0xf] }
 0x6ad   : > { %v2427_v58 = vld [vmem:[#allocation2 + $0x20] sm:$0xff] }
 0x6ae   : > { %2439 = vrot.lane.b32.xlu1 %v2427_v58, %s4092_s22  ;;  %2275 = vrot.lane.b32.xlu0 %v2427_v58, %s3384_s15  ;;  %v2425_v59 = vld [vmem:[#allocation2 + $0x8] sm:$0xff] }
 0x6b2   : > { %2435 = vrot.lane.b32.xlu1 %v2425_v59, %s4092_s22  ;;  %2330 = vrot.lane.b32.xlu0 %v2427_v58, %s3383_s25 }
 0x6b6   : > { %2493 = vrot.lane.b32.xlu1 %v2425_v59, %s3386_s27  ;;  %2271 = vrot.lane.b32.xlu0 %v2425_v59, %s3384_s15 }
 0x6ba   : > { %2497 = vrot.lane.b32.xlu1 %v2427_v58, %s3386_s27  ;;  %2326 = vrot.lane.b32.xlu0 %v2425_v59, %s3383_s25  ;;  %s4093_s25 = sshll.u32 %s3555_s13, 2 }
 0x6bb   : > { %s401_s15 = scalar_lea.vmem [#allocation7], %s4093_s25 }
 0x6be   : > { %2552 = vperm.xlu1 %3210, %v2549_v0   ;;  %2437 = vrot.lane.b32.xlu0 %v3784_v2, %s4092_s22 }
 0x6c2   : > { %2495 = vrot.lane.b32.xlu0 %v3784_v2, %s3386_s27 }
 0x6c6   : > { %2441 = vrot.lane.b32.xlu0 %v3791_v4, %s4092_s22 }
 0x6ca   : > { %2499 = vrot.lane.b32.xlu0 %v3791_v4, %s3386_s27  ;;  %v2794_v4 = vld [vmem:[%s4075_s9 + $0x2] sm:$0x3]  ;;  %s2572_s27 = sshll.u32 %s401_s15, 4  ;;  %s4024_s27 = int_to_ptr.vmem [resolvable:$true] %s2572_s27 }
 0x6cb   : > { %s3313_s24 = scalar_lea.vmem %s4024_s27, 64  ;;  %p3320_p7 = scmp.lt.s32.totalorder %s4024_s27, %s3318_s19 }
 0x6cc   : > { %p3314_p6 = scmp.ne.s32.totalorder %s4024_s27, %s3313_s24  ;;  %p3321_p10 = scmp.lt.s32.totalorder %s3319_s16, %s3313_s24 }
 0x6ce   : > { %p3315_p12 = pnand %p3314_p6, %p4094_p11  ;;  %p3322_p2 = por %p3321_p10, %p3320_p7 }
 0x6d0   : > { %p3316_p13 = pneg %p3315_p12 }
 0x6d2   : > { %p3323_p4 = pnand %p3322_p2, %p3316_p13 }
 0x720   : > { %v2276_v3 = vpop.permute.xlu0 %2275  ;;  %v2440_v7 = vpop.permute.xlu1 %2439 }
 0x721   : > { %v2278_v8 = vsel %vm447_vm5, %v2274_v61, %v2276_v3 }
 0x724   : > { %v2331_v5 = vpop.permute.xlu0 %2330  ;;  %v2436_v10 = vpop.permute.xlu1 %2435 }
 0x725   : > { %v2333_v12 = vsel %vm408_vm2, %v2329_v6, %v2331_v5 }
 0x728   : > { %v2272_v62 = vpop.permute.xlu0 %2271  ;;  %v2494_v38 = vpop.permute.xlu1 %2493 }
 0x729   : > { %v2277_v1 = vsel %vm447_vm5, %v2270_v60, %v2272_v62 }
 0x72a   : > { %3048 = vmatpush3.bf16.msra.mxu0 %v2277_v1 }
 0x72b   : > { %3049 = vmatprep.subr.bf16.mxu0 %v3387_v57 }
 0x72c   : > { %v2327_v2 = vpop.permute.xlu0 %2326  ;;  %v2498_v18 = vpop.permute.xlu1 %2497 }
 0x72d   : > { %v2332_v9 = vsel %vm408_vm2, %v2325_v63, %v2327_v2 }
 0x72e   : > { %3050 = vmatpush3.bf16.msra.mxu0 %v2278_v8  ;;  %3056 = vmatpush3.bf16.msra.mxu1 %v2332_v9 }
 0x72f   : > { %3057 = vmatprep.subr.bf16.mxu1 %v3387_v57  ;;  %3063 = vmatprep.subr.bf16.mxu0 %v3387_v57 }
 0x730   : > { %v2438_v11 = vpop.permute.xlu0 %2437 }
 0x731   : > { %3052 = vmatmul.mubr.msk.bf16.vlgmr.msra.gmra.mrb[8].mxu0 %vm907_vm9, %v2794_v4  ;;  %v2443_v13 = vsel %vm683_vm7, %v2436_v10, %v2438_v11 }
 0x732   : > { %3058 = vmatpush3.bf16.msra.mxu1 %v2333_v12  ;;  %3064 = vmatpush3.bf16.msra.mxu0 %v2425_v59 }
 0x733   : > { %3065 = vmatprep.subr.bf16.mxu0 %v3387_v57  ;;  %3071 = vmatprep.subr.bf16.mxu1 %v3387_v57 }
 0x734   : > { %v2496_v40 = vpop.permute.xlu0 %2495  ;;  %3067 = vmatprep.mubr.msk.bf16.mxu0 %vm3388_vm10, %v3387_v57 }
 0x735   : > { %3060 = vmatmul.mubr.msk.bf16.vlgmr.msra.gmra.mrb[8].mxu1 %vm907_vm9, %v2262_v37  ;;  %v2501_v15 = vsel %vm766_vm8, %v2494_v38, %v2496_v40 }
 0x736   : > { %3066 = vmatpush3.bf16.msra.mxu0 %v2427_v58  ;;  %3072 = vmatpush3.bf16.msra.mxu1 %v2443_v13 }
 0x737   : > { %3073 = vmatprep.subr.bf16.mxu1 %v3387_v57  ;;  %3079 = vmatprep.subr.bf16.mxu0 %v3387_v57 }
 0x738   : > { %v2442_v14 = vpop.permute.xlu0 %2441  ;;  %3075 = vmatprep.mubr.msk.bf16.mxu1 %vm3388_vm10, %v3387_v57 }
 0x739   : > { %v2444_v16 = vsel %vm683_vm7, %v2440_v7, %v2442_v14  ;;  %3068 = vmatmul.mubr.msk.bf16.vlgmr.msra.gmra.mrb[12].mxu0 %vm907_vm9, %v2797_v39 }
 0x73a   : > { %3074 = vmatpush3.bf16.msra.mxu1 %v2444_v16  ;;  %3080 = vmatpush3.bf16.msra.mxu0 %v2501_v15 }
 0x73b   : > { %3081 = vmatprep.subr.bf16.mxu0 %v3387_v57  ;;  %3083 = vmatprep.mubr.msk.bf16.mxu0 %vm3388_vm10, %v3387_v57 }
 0x73c   : > { %v2500_v19 = vpop.permute.xlu0 %2499 }
 0x73d   : > { %v2502_v20 = vsel %vm766_vm8, %v2498_v18, %v2500_v19  ;;  %3076 = vmatmul.mubr.msk.bf16.vlgmr.msra.gmra.mrb[12].mxu1 %vm907_vm9, %v2799_v17  ;;  %v2553_v48 = vpop.permute.xlu1 %2552 }
 0x73e   : > { %3082 = vmatpush3.bf16.msra.mxu0 %v2502_v20 }
 0x741   : > { %3084 = vmatmul.mubr.msk.bf16.vlgmr.msra.gmra.mrb[16].mxu0 %vm907_vm9, %v2801_v21 }
 0x804   : > { %v2318_v22 = vpop.f32.mrb[8].mxu0 }
 0x805   : > { %v3053_v23 = vpop.f32.mrb[9].mxu0 }
 0x806   : > { %v2321_v24 = vpop.f32.mrb[10].mxu0 }
 0x807   : > { %v3054_v25 = vpop.f32.mrb[11].mxu0 }
 0x808   : > { %v2373_v26 = vpop.f32.mrb[8].mxu1 }
 0x809   : > { %v2374_v27 = vadd.f32 %v2373_v26, %v2318_v22  ;;  %v3061_v28 = vpop.f32.mrb[9].mxu1 }
 0x80a   : > { %v2376_v29 = vpop.f32.mrb[10].mxu1 }
 0x80b   : > { %v3062_v30 = vpop.f32.mrb[11].mxu1 }
 0x80c   : > { %v2418_v31 = vpop.f32.mrb[12].mxu0 }
 0x80d   : > { %v2424_v32 = vadd.f32 %v2418_v31, %v2374_v27  ;;  %v3069_v33 = vpop.f32.mrb[13].mxu0 }
 0x80e   : > { %v2421_v34 = vpop.f32.mrb[14].mxu0 }
 0x80f   : > { %v3070_v35 = vpop.f32.mrb[15].mxu0 }
 0x810   : > { %v2484_v36 = vpop.f32.mrb[12].mxu1 }
 0x811   : > { %v2490_v41 = vadd.f32 %v2484_v36, %v2424_v32  ;;  %v3077_v42 = vpop.f32.mrb[13].mxu1 }
 0x812   : > { %v2487_v43 = vpop.f32.mrb[14].mxu1 }
 0x813   : > { %v3078_v44 = vpop.f32.mrb[15].mxu1 }
 0x814   : > { %v2542_v45 = vpop.f32.mrb[16].mxu0 }
 0x815   : > { %v2548_v46 = vadd.f32 %v2542_v45, %v2490_v41  ;;  %v3085_v47 = vpop.f32.mrb[17].mxu0 }
 0x816   : > { %v2545_v49 = vpop.f32.mrb[18].mxu0 }
 0x817   : > { %v2555_v50 = vadd.f32 %v2553_v48, %v2548_v46  ;;  %v3086_v51 = vpop.f32.mrb[19].mxu0 }
 0x819   : > { %2557 = vst.msk [vmem:[%s401_s15] sm:$0xf] %vm2556_vm11, %v2555_v50 }
 0x81a   : > { %3326 = shalt.err (!%p3323_p4)
}
 0x81b   : > { %s3327_s13 = scalar_lea.hbm %s4022_s28, 64  ;;  %s3331_s15 = scalar_lea.hbm %s4077_s11, 128 }
 0x81c   : > { %p3328_p5 = scmp.ne.s32.totalorder %s4022_s28, %s3327_s13  ;;  %p3332_p0 = scmp.lt.u32.totalorder %s4022_s28, %s4077_s11 }
 0x81d   : > { %p3333_p1 = scmp.lt.u32.totalorder %s3331_s15, %s3327_s13  ;;  %p3335_p6 = scmp.lt.u32.totalorder %s3327_s13, %s4022_s28 }
 0x81e   : > { %p3329_p8 = pnand %p3328_p5, %p4094_p11 }
 0x81f   : > { %p3334_p3 = por %p3333_p1, %p3332_p0 }
 0x820   : > { %p3330_p9 = pneg %p3329_p8 }
 0x821   : > { %p3336_p12 = por %p3335_p6, %p3334_p3 }
 0x823   : > { %p3337_p13 = pnand %p3336_p12, %p3330_p9 }
 0x825   : > { %3340 = shalt.err (!%p3337_p13)
}
 0x826   : > { %3158 = dma.vmem_to_hbm [thread:$0]  (%p4094_p11), %s4024_s27, 64, %s4022_s28, %s2559_s21  }
 0x827 PF: > { %s2584_s24 = sand.u32 1, %s3367_s17   ;;  %p4095_p7 = scmp.ne.s32.totalorder %s4088_s30, 0 }
 0x828   : > { %p4096_p10 = scmp.ge.s32.totalorder %s3379_s20, 2  ;;  %s2585_s14 = scalar_lea.sflag [#allocation6], %s2584_s24 }
 0x82a   : > { %p3165_p2 = pnand %p4096_p10, %p4095_p7 }
 0x82c   : > { %3362 = dma.done.wait (!%p3165_p2), %s2585_s14, 64  }
 0x82d   : > { %3364 = vsyncadd (!%p3165_p2), %s2585_s14, 4294967232  ;;  %s4097_s19 = sld [smem:[#allocation10_spill]]  ;;  %s4098_s16 = sld [smem:[#allocation11_spill]] }
 0x82e   : > { %p24_p4 = scmp.ge.s32.totalorder %s3475_s23, 4   ;;  %s4099_s17 = smov %s3371_s18 }
 0x82f   : > { %s4102_s20 = smov %s3475_s23 }
 0x830   :  { %26 = sbr.rel (!%p24_p4) target bundleno = 5 (0x5), region = 129 }
 0x833   : > { %s4100_s18 = smov %s4097_s19  ;;  %s4101_s19 = smov %s4098_s16 }
 0x837   :  { %2590 = vsyncpa [#allocation5], 1 }
 0x838   :  { %2592 = vsyncpa [#allocation5 + $0x1], 1 }
 0x839   :  { %2593 = vsyncpa [#allocation6], 1 }
 0x83a   :  { %2595 = vsyncpa [#allocation6 + $0x1], 1 }

</bundles_post_ra>
